<compile_context>
chip_gen: v6e
topology: v6e:2x2x1
jax: 0.10.0
libtpu: 0.0.40
codegen_flags: <defaults>
</compile_context>

<pallas_src>
from functools import partial

import numpy as np
import jax
import jax.numpy as jnp
from jax.experimental import pallas as pl
from jax.experimental.pallas import tpu as pltpu

HIDDEN = 32       # small synthetic hidden size (module default is 768)
TILE_P = 512      # pair-dim tile target at scale (v7x <= ~1024 with 64 MiB VMEM;
                  # v5e/v6e can go 1024-2048).  Clamped below so tiny P doesn't over-pad.

_RESIDENT_MODE = None   # set in __main__: pl.Buffered(1) for resident weights if supported


def _round_up(x, m):
    return ((x + m - 1) // m) * m


def _probe_single_buffer_weights():
    """Resident (constant-index) weights don't need double buffering; pl.Buffered(1) halves
    their VMEM footprint (matters under v7x's 64 MiB VMEM).  Probe once so builds that
    reject pipeline_mode fall back to default double-buffering instead of failing."""
    def _k(x_ref, o_ref):
        o_ref[...] = x_ref[...] + 1.0
    try:
        mode = pl.Buffered(buffer_count=1)
        f = pl.pallas_call(
            _k,
            out_shape=jax.ShapeDtypeStruct((8, 128), jnp.float32),
            grid=(1,),
            in_specs=[pl.BlockSpec((8, 128), lambda i: (0, 0), pipeline_mode=mode)],
            out_specs=pl.BlockSpec((8, 128), lambda i: (0, 0)),
        )
        jax.block_until_ready(f(jnp.zeros((8, 128), jnp.float32)))
        return mode
    except Exception:
        return None


def _classifier_vmem_limit(tile_p, d, hid, out_pad, single_buffer_weights):
    """Rough per-step VMEM footprint for the classifier, clamped per generation."""
    in_b = 2 * 2 * tile_p * d * 2                                  # heads+tails bf16, double-buffered
    out_b = 2 * tile_p * out_pad * 4                               # f32 logits tile, double-buffered
    w_b = 2 * (2 * d * hid + hid * 512 + 512 * 256 + 256 * out_pad)   # bf16 weights
    w_b += 4 * (2 * hid + 512 + 256 + out_pad)                     # f32 biases + w1 sim row
    if not single_buffer_weights:
        w_b *= 2
    act_b = 4 * tile_p * (hid + 512 + 256 + out_pad)               # f32 intermediates (scoped)
    est = int(1.5 * (in_b + out_b + w_b + act_b))
    try:
        cap = int(pltpu.get_tpu_info().vmem_capacity_bytes)        # 128 MiB v5e/v6e, 64 MiB v7x
    except Exception:
        cap = 64 * 1024 * 1024
    return int(min(max(est, 32 * 1024 * 1024), int(0.75 * cap)))


# ---------------------------------------------------------------------------
# Kernel 1: per-batch 1/(std(cosine_sim) + 1e-5)
#   grid=(B,); one padded (NE_pad, D) bf16 entity block per grid step.
#   Only B scalars leave the kernel (no (B, NE, NE) HBM round trip).
# ---------------------------------------------------------------------------
def _batch_inv_std_kernel(ne_ref, e_ref, o_ref):
    b = pl.program_id(0)
    ne = ne_ref[b]                                                  # valid entities (SMEM scalar)
    e = e_ref[...].astype(jnp.float32)                              # (NE_pad, D)
    # F.cosine_similarity: x / max(|x|, 1e-8) == x * rsqrt(max(|x|^2, 1e-16))   (EUP rsqrt)
    en = e * jax.lax.rsqrt(jnp.maximum(jnp.sum(e * e, axis=-1, keepdims=True), 1e-16))
    s = jax.lax.dot_general(en, en, (((1,), (1,)), ((), ())),
                            preferred_element_type=jnp.float32)     # (NE_pad, NE_pad)
    ne_pad = s.shape[0]
    rows = jax.lax.broadcasted_iota(jnp.int32, (ne_pad, ne_pad), 0)
    cols = jax.lax.broadcasted_iota(jnp.int32, (ne_pad, ne_pad), 1)
    valid = ((rows < ne) & (cols < ne)).astype(jnp.float32)
    # torch .std(): unbiased (n-1), over the full valid NE x NE matrix incl. the diagonal
    # (the reference takes .std() before triu).  ne==1 diverges from torch (NaN there).
    n = (ne * ne).astype(jnp.float32)
    mean = jnp.sum(s * valid) / n
    var = jnp.sum((valid * (s - mean)) ** 2) / jnp.maximum(n - 1.0, 1.0)
    std = jnp.sqrt(var)
    # emit 1/(std + 1e-5) broadcast into one lane-dense tile (robust way to return B scalars)
    o_ref[...] = pl.reciprocal(jnp.full((8, 128), std + 1e-5, jnp.float32), approx=True)


def batch_inv_std_pallas(e_bf16, ne_arr):
    B, ne_pad, d = e_bf16.shape
    out = pl.pallas_call(
        _batch_inv_std_kernel,
        out_shape=jax.ShapeDtypeStruct((B, 8, 128), jnp.float32),
        grid=(B,),
        in_specs=[
            pl.BlockSpec(memory_space=pltpu.MemorySpace.SMEM),       # ne per batch (int32)
            pl.BlockSpec((None, ne_pad, d), lambda b: (b, 0, 0)),    # bf16 entity block (squeezed B)
        ],
        out_specs=pl.BlockSpec((None, 8, 128), lambda b: (b, 0, 0)),
        compiler_params=pltpu.CompilerParams(dimension_semantics=("parallel",)),
        # NOTE(v5e): if NE_pad grows, set vmem_limit_bytes here (v5e default scoped VMEM is 16 MiB).
    )(ne_arr, e_bf16)
    return out[:, 0, 0]                                              # (B,) f32


# ---------------------------------------------------------------------------
# Kernel 2: classifier MLP (Linear->ReLU x3 -> Linear); Dropout == identity.
#   grid over P tiles; resident bf16 weights (single-buffered when supported),
#   in-kernel per-pair cosine similarity, f32 accumulation, narrow/lane-dense output.
# ---------------------------------------------------------------------------
def classifier_pallas(heads, tails, inv_std, thr, pair_offsets, params, tile_p=TILE_P):
    P, d = heads.shape
    hid = params["w1"].shape[1]
    nb = int(inv_std.shape[0])
    # Review item 6: lane-dense 128-wide logits only pay off once input traffic dominates
    # (real hidden >= 256); in the small-D regime a narrow masked-store output is 16x fewer bytes.
    out_pad = 128 if hid >= 256 else 8

    # split w1: row 0 = similarity column (rank-1 VPU add, f32), rows 1..d = head, d+1..2d = tail
    w1 = params["w1"]
    w1s = w1[0:1, :]
    w1h = w1[1:1 + d, :].astype(jnp.bfloat16)
    w1t = w1[1 + d:, :].astype(jnp.bfloat16)
    w2 = params["w2"].astype(jnp.bfloat16)
    w3 = params["w3"].astype(jnp.bfloat16)
    w4 = jnp.pad(params["w4"], ((0, 0), (0, out_pad - params["w4"].shape[1]))).astype(jnp.bfloat16)
    b1, b2, b3 = params["b1"], params["b2"], params["b3"]
    b4 = jnp.pad(params["b4"], ((0, 0), (0, out_pad - params["b4"].shape[1])))

    # Big tiles amortize the ~0.35us/step overhead and fill the MXU M dim; clamp so tiny
    # problems don't over-pad.  At scale pick tile_p so the grid is >=2 and even (v7x TCs).
    tile_p = max(8, min(tile_p, _round_up(P, 128)))
    p_pad = _round_up(P, tile_p)
    heads_p = jnp.pad(heads, ((0, p_pad - P), (0, 0)))
    tails_p = jnp.pad(tails, ((0, p_pad - P), (0, 0)))

    mode = _RESIDENT_MODE

    def resident(arr):          # same block every grid step; single-buffered when supported
        if mode is None:
            return pl.BlockSpec(arr.shape, lambda i: (0, 0))
        return pl.BlockSpec(arr.shape, lambda i: (0, 0), pipeline_mode=mode)

    def kernel(inv_std_ref, thr_ref, h_ref, t_ref,
               w1h_ref, w1t_ref, w1s_ref, b1_ref,
               w2_ref, b2_ref, w3_ref, b3_ref, w4_ref, b4_ref, o_ref):
        h_bf = h_ref[...]
        t_bf = t_ref[...]
        hf = h_bf.astype(jnp.float32)
        tf = t_bf.astype(jnp.float32)
        # per-pair cosine similarity recomputed in-kernel (no HBM sims round trip / 1-lane DMA)
        ht = jnp.sum(hf * tf, axis=-1, keepdims=True)
        hh = jnp.maximum(jnp.sum(hf * hf, axis=-1, keepdims=True), 1e-16)
        tt = jnp.maximum(jnp.sum(tf * tf, axis=-1, keepdims=True), 1e-16)
        cos = ht * jax.lax.rsqrt(hh * tt)                 # == F.cosine_similarity (eps=1e-8)
        # per-pair 1/(std_b + 1e-5): pair rows are batch-contiguous with trace-time-constant
        # boundaries, so a few selects on a broadcasted iota replace any gather.
        row = pl.program_id(0) * tile_p + jax.lax.broadcasted_iota(jnp.int32, (tile_p, 1), 0)
        inv = jnp.zeros((tile_p, 1), jnp.float32)
        for b in range(nb):
            in_b = (row >= pair_offsets[b]) & (row < pair_offsets[b + 1])
            inv = jnp.where(in_b, inv_std_ref[b], inv)
        sim = (cos - thr_ref[0]) * inv                    # padded rows: inv == 0 -> finite
        # layer 1: two K=d MXU matmuls (heads, tails) + rank-1 VPU add for the sim column
        z = jnp.dot(h_bf, w1h_ref[...], preferred_element_type=jnp.float32)
        z = z + jnp.dot(t_bf, w1t_ref[...], preferred_element_type=jnp.float32)
        z = z + sim * w1s_ref[...] + b1_ref[...]
        z = jnp.maximum(z, 0.0)                           # Dropout(0.4) == identity (inference)
        z = jnp.dot(z.astype(jnp.bfloat16), w2_ref[...],
                    preferred_element_type=jnp.float32) + b2_ref[...]
        z = jnp.maximum(z, 0.0)
        z = jnp.dot(z.astype(jnp.bfloat16), w3_ref[...],
                    preferred_element_type=jnp.float32) + b3_ref[...]
        z = jnp.maximum(z, 0.0)
        o_ref[...] = jnp.dot(z.astype(jnp.bfloat16), w4_ref[...],
                             preferred_element_type=jnp.float32) + b4_ref[...]

    out = pl.pallas_call(
        kernel,
        out_shape=jax.ShapeDtypeStruct((p_pad, out_pad), jnp.float32),
        grid=(p_pad // tile_p,),
        in_specs=[
            pl.BlockSpec(memory_space=pltpu.MemorySpace.SMEM),       # inv_std  (B,)  f32
            pl.BlockSpec(memory_space=pltpu.MemorySpace.SMEM),       # threshold (1,) f32
            pl.BlockSpec((tile_p, d), lambda i: (i, 0)),             # heads tile (bf16)
            pl.BlockSpec((tile_p, d), lambda i: (i, 0)),             # tails tile (bf16)
            resident(w1h), resident(w1t), resident(w1s), resident(b1),
            resident(w2), resident(b2),
            resident(w3), resident(b3),
            resident(w4), resident(b4),
        ],
        out_specs=pl.BlockSpec((tile_p, out_pad), lambda i: (i, 0)),
        compiler_params=pltpu.CompilerParams(
            dimension_semantics=("parallel",),                       # shard P tiles across v7x TCs
            vmem_limit_bytes=_classifier_vmem_limit(tile_p, d, hid, out_pad, mode is not None)),
    )(inv_std, thr, heads_p, tails_p, w1h, w1t, w1s, b1, w2, b2, w3, b3, w4, b4)
    return out[:P, :2]


# ---------------------------------------------------------------------------
# Glue: params, pair tables, pooling, focal loss, cluster decoding, forward
# ---------------------------------------------------------------------------
def init_params(key, hidden=HIDDEN):
    dims = [(2 * hidden + 1, hidden), (hidden, 512), (512, 256), (256, 2)]
    params = {"threshold": jnp.asarray(0.9, jnp.float32)}
    for idx, (fin, fout) in enumerate(dims, start=1):
        key, k_w, k_b = jax.random.split(key, 3)
        bound = 1.0 / np.sqrt(fin)
        params[f"w{idx}"] = jax.random.uniform(k_w, (fin, fout), jnp.float32, -bound, bound)
        params[f"b{idx}"] = jax.random.uniform(k_b, (1, fout), jnp.float32, -bound, bound)
    return params


def build_pair_tables(entity_pos, ne_pad):
    """Static upper-triangular pair index tables (same ordering as the reference loops)."""
    head_idx, tail_idx = [], []
    for b, ents in enumerate(entity_pos):
        iu, ju = np.triu_indices(len(ents), k=1)
        head_idx.append(b * ne_pad + iu)
        tail_idx.append(b * ne_pad + ju)
    cat = lambda xs: jnp.asarray(np.concatenate(xs).astype(np.int32))
    return cat(head_idx), cat(tail_idx)


def pool_entities(x, entity_pos, ne_pad):
    """get_hrt: max-pooled entity span embeddings, padded to (B, NE_pad, D)."""
    B, L, D = x.shape
    blocks = []
    for i in range(B):
        embs = []
        for (start, end) in entity_pos[i]:
            if start < L and end < L:               # reference bounds check (attention width == L)
                embs.append(jnp.max(x[i, start:end], axis=0))
            else:
                embs.append(jnp.zeros((D,), x.dtype))
        e = jnp.stack(embs, axis=0)
        blocks.append(jnp.pad(e, ((0, ne_pad - e.shape[0]), (0, 0))))
    return jnp.stack(blocks, axis=0)


def focal_loss(logits, labels, gamma=2.0, eps=1e-8):
    # TODO(synk): FocalLoss class is not defined in the reference file; a standard
    # sigmoid binary focal loss (gamma=2, mean reduction) is used here.
    p = jax.nn.sigmoid(logits)
    ce = -(labels * jnp.log(p + eps) + (1.0 - labels) * jnp.log(1.0 - p + eps))
    pt = labels * p + (1.0 - labels) * (1.0 - p)
    return jnp.mean(((1.0 - pt) ** gamma) * ce)


@partial(jax.jit, static_argnames=("entity_pos", "ne_pad"))
def device_forward(params, x, labels, head_idx, tail_idx, ne_arr, entity_pos, ne_pad):
    B, L, D = x.shape
    e_padded = pool_entities(x, entity_pos, ne_pad)                   # (B, NE_pad, D) f32
    e_bf = e_padded.astype(jnp.bfloat16)                              # halves kernel-1/gather traffic
    inv_std = batch_inv_std_pallas(e_bf, ne_arr)                      # Pallas kernel 1 -> (B,) f32

    # single vectorized gathers; heads/tails stay separate (no [heads|tails] concat in HBM).
    # TODO(synk): at large P/hidden these gathers could move in-kernel (scalar-prefetched
    # indices + VMEM-resident e_flat) if they show up in profiles.
    e_flat = e_bf.reshape(B * ne_pad, D)
    heads = jnp.take(e_flat, head_idx, axis=0)                        # (P, D) bf16
    tails = jnp.take(e_flat, tail_idx, axis=0)                        # (P, D) bf16

    counts = [len(e) * (len(e) - 1) // 2 for e in entity_pos]         # trace-time constants
    pair_offsets = tuple(int(v) for v in np.cumsum([0] + counts))
    thr = jnp.reshape(params["threshold"].astype(jnp.float32), (1,))

    logits = classifier_pallas(heads, tails, inv_std, thr, pair_offsets, params)  # Pallas kernel 2
    loss = focal_loss(logits, labels)
    return logits, loss


def get_coreference_clusters(hts, entity_pos, logits_np):
    # faithful Python port of the reference list-manipulation logic (host side)
    ex = np.exp(logits_np - logits_np.max(axis=1, keepdims=True))
    probs = ex / ex.sum(axis=1, keepdims=True)
    clusters_all = []
    offset = 0
    for i in range(len(hts)):
        coreferences = []
        for j in range(len(hts[i])):
            if probs[offset + j][1] >= 0.5:
                e1i, e2i = hts[i][j]
                ent1 = entity_pos[i][e1i]
                ent2 = entity_pos[i][e2i]
                ent1_cluster = None
                ent2_cluster = None
                for cluster in coreferences:
                    if ent1 in cluster:
                        ent1_cluster = cluster
                    if ent2 in cluster:
                        ent2_cluster = cluster
                if ent1_cluster != ent2_cluster:
                    if ent1_cluster:
                        ent1_cluster.append(ent2)
                    elif ent2_cluster:
                        ent2_cluster.append(ent1)
                elif not ent1_cluster and (not ent2_cluster):
                    coreferences.append([ent1, ent2])
        for remaining_entity in entity_pos[i]:
            in_cluster = False
            for cluster in coreferences:
                if remaining_entity in cluster:
                    in_cluster = True
                    break
            if not in_cluster:
                coreferences.append([remaining_entity])
        coreferences = [list(set(cluster)) for cluster in coreferences]
        for index, c1 in enumerate(coreferences[:-1]):
            for c2 in coreferences[index + 1:]:
                if c2 == c1 or c2 in c1:
                    coreferences.remove(c2)
                    if len(coreferences) == 1:
                        break
        coreferences = [sorted(cluster) for cluster in coreferences]
        clusters_all.append(sorted(coreferences))
        offset += len(hts[i])
    return clusters_all


# ---------------------------------------------------------------------------
# Main
# ---------------------------------------------------------------------------
if __name__ == "__main__":
    _RESIDENT_MODE = _probe_single_buffer_weights()   # pl.Buffered(1) for resident weights if supported

    key = jax.random.PRNGKey(0)
    k_params, k_x, k_att = jax.random.split(key, 3)

    B, L, D, H_heads = 2, 16, HIDDEN, 4
    params = init_params(k_params, hidden=D)

    x = jax.random.normal(k_x, (B, L, D), jnp.float32)
    attention = jax.random.uniform(k_att, (B, H_heads, L, L), jnp.float32)
    # NOTE: in the reference, attention only feeds entity_atts inside get_hrt and the
    # forward pass discards them, so attention is unused beyond its width bound.

    entity_pos = [
        [(0, 2), (3, 5), (6, 8), (9, 12)],   # 4 entities -> 6 pairs
        [(1, 3), (4, 7), (8, 10)],           # 3 entities -> 3 pairs
    ]
    hts = [
        [(i, j) for i in range(4) for j in range(i + 1, 4)],
        [(i, j) for i in range(3) for j in range(i + 1, 3)],
    ]
    coreference_labels = [
        np.eye(2, dtype=np.float32)[np.array([0, 1, 0, 0, 1, 0])],  # (6, 2) one-hot
        np.eye(2, dtype=np.float32)[np.array([1, 0, 0])],           # (3, 2) one-hot
    ]

    ne_max = max(len(e) for e in entity_pos)
    ne_pad = max(8, ((ne_max + 7) // 8) * 8)            # round entity dim up to sublane multiple
    ne_arr = jnp.asarray([len(e) for e in entity_pos], jnp.int32)
    head_idx, tail_idx = build_pair_tables(entity_pos, ne_pad)
    labels = jnp.concatenate([jnp.asarray(l, jnp.float32) for l in coreference_labels], axis=0)
    entity_pos_static = tuple(tuple((int(s), int(e)) for (s, e) in ents) for ents in entity_pos)

    logits, loss = device_forward(params, x, labels, head_idx, tail_idx,
                                  ne_arr, entity_pos_static, ne_pad)
    jax.block_until_ready(logits)
    jax.block_until_ready(loss)

    clusters = get_coreference_clusters(hts, entity_pos, np.asarray(logits))

    assert logits.shape == (9, 2)
    assert np.isfinite(np.asarray(loss))
    assert np.isfinite(np.asarray(logits)).all()
    assert len(clusters) == B
    print("KERNEL_OK")
</pallas_src>

<mosaic_0001>
module attributes {stable_mosaic.version = 11 : i64} {
  func.func @_k(%arg0: i32, %arg1: memref<8x128xf32, #tpu.memory_space<vmem>>, %arg2: memref<8x128xf32, #tpu.memory_space<vmem>>) attributes {dimension_semantics = [#tpu.dimension_semantics<arbitrary>], iteration_bounds = array<i64: 1>, scalar_prefetch = 0 : i64, scratch_operands = 0 : i64, tpu.core_type = #tpu.core_type<tc>, window_params = [{pipeline_mode = #tpu.pipeline_mode<synchronous>, transform_indices = @transform_0, window_bounds = array<i64: 8, 128>}, {pipeline_mode = #tpu.pipeline_mode<synchronous>, transform_indices = @transform_1, window_bounds = array<i64: 8, 128>}]} {
    %c0 = arith.constant 0 : index
    %c0_0 = arith.constant 0 : index
    %0 = vector.load %arg1[%c0, %c0_0] : memref<8x128xf32, #tpu.memory_space<vmem>>, vector<8x128xf32>
    %cst = arith.constant 1.000000e+00 : f32
    %1 = vector.broadcast %cst : f32 to vector<8x128xf32>
    %2 = arith.addf %0, %1 : vector<8x128xf32>
    %c0_1 = arith.constant 0 : index
    %c0_2 = arith.constant 0 : index
    %3 = vector.load %arg2[%c0_1, %c0_2] : memref<8x128xf32, #tpu.memory_space<vmem>>, vector<8x128xf32>
    tpu.vector_store %arg2[%c0_1, %c0_2], %2 {strides = array<i32>} : memref<8x128xf32, #tpu.memory_space<vmem>>, vector<8x128xf32>,
    return
  }
  func.func @transform_0(%arg0: i32) -> (i32, i32) {
    %c0_i32 = arith.constant 0 : i32
    %c0_i32_0 = arith.constant 0 : i32
    %c0_i32_1 = arith.constant 0 : i32
    return %c0_i32, %c0_i32_0 : i32, i32
  }
  func.func @transform_1(%arg0: i32) -> (i32, i32) {
    %c0_i32 = arith.constant 0 : i32
    %c0_i32_0 = arith.constant 0 : i32
    %c0_i32_1 = arith.constant 0 : i32
    return %c0_i32, %c0_i32_0 : i32, i32
  }
}

module attributes {stable_mosaic.version = 11 : i64} {
  func.func @_batch_inv_std_kernel(%arg0: i32, %arg1: memref<2xi32, #tpu.memory_space<smem>>, %arg2: memref<1x8x32xbf16, #tpu.memory_space<vmem>>, %arg3: memref<1x8x128xf32, #tpu.memory_space<vmem>>) attributes {dimension_semantics = [#tpu.dimension_semantics<parallel>], iteration_bounds = array<i64: 2>, scalar_prefetch = 0 : i64, scratch_operands = 0 : i64, tpu.core_type = #tpu.core_type<tc>, window_params = [{transform_indices = @transform_0, window_bounds = array<i64: 2>}, {transform_indices = @transform_1, window_bounds = array<i64: 1, 8, 32>}, {transform_indices = @transform_2, window_bounds = array<i64: 1, 8, 128>}]} {
    %0 = arith.index_cast %arg0 : i32 to index
    %1 = memref.load %arg1[%0] : memref<2xi32, #tpu.memory_space<smem>>
    %c0 = arith.constant 0 : index
    %c0_0 = arith.constant 0 : index
    %c0_1 = arith.constant 0 : index
    %2 = vector.load %arg2[%c0, %c0_0, %c0_1] : memref<1x8x32xbf16, #tpu.memory_space<vmem>>, vector<1x8x32xbf16>
    %3 = vector.shape_cast %2 : vector<1x8x32xbf16> to vector<8x32xbf16>
    %4 = arith.extf %3 : vector<8x32xbf16> to vector<8x32xf32>
    %5 = arith.mulf %4, %4 : vector<8x32xf32>
    %cst = arith.constant dense<0.000000e+00> : vector<8xf32>
    %6 = vector.multi_reduction <add>, %5, %cst [1] : vector<8x32xf32> to vector<8xf32>
    %7 = vector.shape_cast %6 : vector<8xf32> to vector<8x1xf32>
    %cst_2 = arith.constant 1.000000e-16 : f32
    %8 = vector.broadcast %cst_2 : f32 to vector<8x1xf32>
    %9 = arith.maximumf %7, %8 : vector<8x1xf32>
    %10 = math.rsqrt %9 : vector<8x1xf32>
    %11 = vector.broadcast %10 : vector<8x1xf32> to vector<8x32xf32>
    %12 = arith.mulf %4, %11 : vector<8x32xf32>
    %cst_3 = arith.constant dense<0.000000e+00> : vector<8x8xf32>
    %13 = tpu.matmul %12, %12, %cst_3 {dimension_numbers = #tpu.dot_dimension_numbers<[1], [1], [0], [0], [0, 0, 1, 0], [], []>} : vector<8x32xf32>, vector<8x32xf32>, vector<8x8xf32> -> vector<8x8xf32>
    %14 = tpu.iota {dimensions = array<i32: 0>} : vector<8x8xi32>
    %15 = tpu.iota {dimensions = array<i32: 1>} : vector<8x8xi32>
    %16 = vector.broadcast %1 : i32 to vector<8x8xi32>
    %17 = arith.cmpi slt, %14, %16 : vector<8x8xi32>
    %18 = vector.broadcast %1 : i32 to vector<8x8xi32>
    %19 = arith.cmpi slt, %15, %18 : vector<8x8xi32>
    %20 = arith.andi %17, %19 : vector<8x8xi1>
    %21 = arith.extui %20 : vector<8x8xi1> to vector<8x8xi32>
    %22 = arith.sitofp %21 : vector<8x8xi32> to vector<8x8xf32>
    %23 = arith.muli %1, %1 : i32
    %24 = arith.sitofp %23 : i32 to f32
    %25 = arith.mulf %13, %22 : vector<8x8xf32>
    %26 = vector.shape_cast %25 : vector<8x8xf32> to vector<1x8x8xf32>
    %cst_4 = arith.constant dense<0.000000e+00> : vector<1xf32>
    %27 = vector.multi_reduction <add>, %26, %cst_4 [1, 2] : vector<1x8x8xf32> to vector<1xf32>
    %28 = vector.shape_cast %27 : vector<1xf32> to vector<1x1x1xf32>
    %29 = vector.extract %28[0, 0, 0] : f32 from vector<1x1x1xf32>
    %30 = arith.divf %29, %24 : f32
    %31 = vector.broadcast %30 : f32 to vector<8x8xf32>
    %32 = arith.subf %13, %31 : vector<8x8xf32>
    %33 = arith.mulf %22, %32 : vector<8x8xf32>
    %34 = arith.mulf %33, %33 : vector<8x8xf32>
    %35 = vector.shape_cast %34 : vector<8x8xf32> to vector<1x8x8xf32>
    %cst_5 = arith.constant dense<0.000000e+00> : vector<1xf32>
    %36 = vector.multi_reduction <add>, %35, %cst_5 [1, 2] : vector<1x8x8xf32> to vector<1xf32>
    %37 = vector.shape_cast %36 : vector<1xf32> to vector<1x1x1xf32>
    %38 = vector.extract %37[0, 0, 0] : f32 from vector<1x1x1xf32>
    %cst_6 = arith.constant 1.000000e+00 : f32
    %39 = arith.subf %24, %cst_6 : f32
    %cst_7 = arith.constant 1.000000e+00 : f32
    %40 = arith.maximumf %39, %cst_7 : f32
    %41 = arith.divf %38, %40 : f32
    %42 = math.sqrt %41 : f32
    %cst_8 = arith.constant 9.99999974E-6 : f32
    %43 = arith.addf %42, %cst_8 : f32
    %44 = vector.broadcast %43 : f32 to vector<8x128xf32>
    %45 = tpu.reciprocal %44 {approx = true} : vector<8x128xf32> -> vector<8x128xf32>
    %c0_9 = arith.constant 0 : index
    %c0_10 = arith.constant 0 : index
    %c0_11 = arith.constant 0 : index
    %46 = vector.load %arg3[%c0_9, %c0_10, %c0_11] : memref<1x8x128xf32, #tpu.memory_space<vmem>>, vector<1x8x128xf32>
    %47 = vector.shape_cast %46 : vector<1x8x128xf32> to vector<8x128xf32>
    %48 = vector.shape_cast %45 : vector<8x128xf32> to vector<1x8x128xf32>
    tpu.vector_store %arg3[%c0_9, %c0_10, %c0_11], %48 {strides = array<i32>} : memref<1x8x128xf32, #tpu.memory_space<vmem>>, vector<1x8x128xf32>,
    return
  }
  func.func @transform_0(%arg0: i32) -> i32 {
    %c0_i32 = arith.constant 0 : i32
    %c0_i32_0 = arith.constant 0 : i32
    return %c0_i32 : i32
  }
  func.func @transform_1(%arg0: i32) -> (i32, i32, i32) {
    %c0_i32 = arith.constant 0 : i32
    %c0_i32_0 = arith.constant 0 : i32
    %c0_i32_1 = arith.constant 0 : i32
    return %arg0, %c0_i32, %c0_i32_0 : i32, i32, i32
  }
  func.func @transform_2(%arg0: i32) -> (i32, i32, i32) {
    %c0_i32 = arith.constant 0 : i32
    %c0_i32_0 = arith.constant 0 : i32
    %c0_i32_1 = arith.constant 0 : i32
    return %arg0, %c0_i32, %c0_i32_0 : i32, i32, i32
  }
}

module attributes {stable_mosaic.version = 11 : i64} {
  func.func @kernel(%arg0: i32, %arg1: memref<2xf32, #tpu.memory_space<smem>>, %arg2: memref<1xf32, #tpu.memory_space<smem>>, %arg3: memref<128x32xbf16, #tpu.memory_space<vmem>>, %arg4: memref<128x32xbf16, #tpu.memory_space<vmem>>, %arg5: memref<32x32xbf16, #tpu.memory_space<vmem>>, %arg6: memref<32x32xbf16, #tpu.memory_space<vmem>>, %arg7: memref<1x32xf32, #tpu.memory_space<vmem>>, %arg8: memref<1x32xf32, #tpu.memory_space<vmem>>, %arg9: memref<32x512xbf16, #tpu.memory_space<vmem>>, %arg10: memref<1x512xf32, #tpu.memory_space<vmem>>, %arg11: memref<512x256xbf16, #tpu.memory_space<vmem>>, %arg12: memref<1x256xf32, #tpu.memory_space<vmem>>, %arg13: memref<256x8xbf16, #tpu.memory_space<vmem>>, %arg14: memref<1x8xf32, #tpu.memory_space<vmem>>, %arg15: memref<128x8xf32, #tpu.memory_space<vmem>>) attributes {dimension_semantics = [#tpu.dimension_semantics<parallel>], iteration_bounds = array<i64: 1>, scalar_prefetch = 0 : i64, scratch_operands = 0 : i64, tpu.core_type = #tpu.core_type<tc>, window_params = [{transform_indices = @transform_0, window_bounds = array<i64: 2>}, {transform_indices = @transform_1, window_bounds = array<i64: 1>}, {transform_indices = @transform_2, window_bounds = array<i64: 128, 32>}, {transform_indices = @transform_3, window_bounds = array<i64: 128, 32>}, {pipeline_mode = #tpu.pipeline_mode<synchronous>, transform_indices = @transform_4, window_bounds = array<i64: 32, 32>}, {pipeline_mode = #tpu.pipeline_mode<synchronous>, transform_indices = @transform_5, window_bounds = array<i64: 32, 32>}, {pipeline_mode = #tpu.pipeline_mode<synchronous>, transform_indices = @transform_6, window_bounds = array<i64: 1, 32>}, {pipeline_mode = #tpu.pipeline_mode<synchronous>, transform_indices = @transform_7, window_bounds = array<i64: 1, 32>}, {pipeline_mode = #tpu.pipeline_mode<synchronous>, transform_indices = @transform_8, window_bounds = array<i64: 32, 512>}, {pipeline_mode = #tpu.pipeline_mode<synchronous>, transform_indices = @transform_9, window_bounds = array<i64: 1, 512>}, {pipeline_mode = #tpu.pipeline_mode<synchronous>, transform_indices = @transform_10, window_bounds = array<i64: 512, 256>}, {pipeline_mode = #tpu.pipeline_mode<synchronous>, transform_indices = @transform_11, window_bounds = array<i64: 1, 256>}, {pipeline_mode = #tpu.pipeline_mode<synchronous>, transform_indices = @transform_12, window_bounds = array<i64: 256, 8>}, {pipeline_mode = #tpu.pipeline_mode<synchronous>, transform_indices = @transform_13, window_bounds = array<i64: 1, 8>}, {transform_indices = @transform_14, window_bounds = array<i64: 128, 8>}]} {
    %c0 = arith.constant 0 : index
    %c0_0 = arith.constant 0 : index
    %0 = vector.load %arg3[%c0, %c0_0] : memref<128x32xbf16, #tpu.memory_space<vmem>>, vector<128x32xbf16>
    %c0_1 = arith.constant 0 : index
    %c0_2 = arith.constant 0 : index
    %1 = vector.load %arg4[%c0_1, %c0_2] : memref<128x32xbf16, #tpu.memory_space<vmem>>, vector<128x32xbf16>
    %2 = arith.extf %0 : vector<128x32xbf16> to vector<128x32xf32>
    %3 = arith.extf %1 : vector<128x32xbf16> to vector<128x32xf32>
    %4 = arith.mulf %2, %3 : vector<128x32xf32>
    %cst = arith.constant dense<0.000000e+00> : vector<128xf32>
    %5 = vector.multi_reduction <add>, %4, %cst [1] : vector<128x32xf32> to vector<128xf32>
    %6 = vector.shape_cast %5 : vector<128xf32> to vector<128x1xf32>
    %7 = arith.mulf %2, %2 : vector<128x32xf32>
    %cst_3 = arith.constant dense<0.000000e+00> : vector<128xf32>
    %8 = vector.multi_reduction <add>, %7, %cst_3 [1] : vector<128x32xf32> to vector<128xf32>
    %9 = vector.shape_cast %8 : vector<128xf32> to vector<128x1xf32>
    %cst_4 = arith.constant 1.000000e-16 : f32
    %10 = vector.broadcast %cst_4 : f32 to vector<128x1xf32>
    %11 = arith.maximumf %9, %10 : vector<128x1xf32>
    %12 = arith.mulf %3, %3 : vector<128x32xf32>
    %cst_5 = arith.constant dense<0.000000e+00> : vector<128xf32>
    %13 = vector.multi_reduction <add>, %12, %cst_5 [1] : vector<128x32xf32> to vector<128xf32>
    %14 = vector.shape_cast %13 : vector<128xf32> to vector<128x1xf32>
    %cst_6 = arith.constant 1.000000e-16 : f32
    %15 = vector.broadcast %cst_6 : f32 to vector<128x1xf32>
    %16 = arith.maximumf %14, %15 : vector<128x1xf32>
    %17 = arith.mulf %11, %16 : vector<128x1xf32>
    %18 = math.rsqrt %17 : vector<128x1xf32>
    %19 = arith.mulf %6, %18 : vector<128x1xf32>
    %c128_i32 = arith.constant 128 : i32
    %20 = arith.muli %arg0, %c128_i32 : i32
    %21 = tpu.iota {dimensions = array<i32: 0>} : vector<128x1xi32>
    %22 = vector.broadcast %20 : i32 to vector<128x1xi32>
    %23 = arith.addi %22, %21 : vector<128x1xi32>
    %cst_7 = arith.constant 0.000000e+00 : f32
    %24 = vector.broadcast %cst_7 : f32 to vector<128x1xf32>
    %c0_i32 = arith.constant 0 : i32
    %25 = vector.broadcast %c0_i32 : i32 to vector<128x1xi32>
    %26 = arith.cmpi sge, %23, %25 : vector<128x1xi32>
    %c6_i32 = arith.constant 6 : i32
    %27 = vector.broadcast %c6_i32 : i32 to vector<128x1xi32>
    %28 = arith.cmpi slt, %23, %27 : vector<128x1xi32>
    %29 = arith.andi %26, %28 : vector<128x1xi1>
    %c0_8 = arith.constant 0 : index
    %30 = memref.load %arg1[%c0_8] : memref<2xf32, #tpu.memory_space<smem>>
    %31 = vector.broadcast %30 : f32 to vector<128x1xf32>
    %32 = arith.select %29, %31, %24 : vector<128x1xi1>, vector<128x1xf32>
    %c6_i32_9 = arith.constant 6 : i32
    %33 = vector.broadcast %c6_i32_9 : i32 to vector<128x1xi32>
    %34 = arith.cmpi sge, %23, %33 : vector<128x1xi32>
    %c9_i32 = arith.constant 9 : i32
    %35 = vector.broadcast %c9_i32 : i32 to vector<128x1xi32>
    %36 = arith.cmpi slt, %23, %35 : vector<128x1xi32>
    %37 = arith.andi %34, %36 : vector<128x1xi1>
    %c1 = arith.constant 1 : index
    %38 = memref.load %arg1[%c1] : memref<2xf32, #tpu.memory_space<smem>>
    %39 = vector.broadcast %38 : f32 to vector<128x1xf32>
    %40 = arith.select %37, %39, %32 : vector<128x1xi1>, vector<128x1xf32>
    %c0_10 = arith.constant 0 : index
    %41 = memref.load %arg2[%c0_10] : memref<1xf32, #tpu.memory_space<smem>>
    %42 = vector.broadcast %41 : f32 to vector<128x1xf32>
    %43 = arith.subf %19, %42 : vector<128x1xf32>
    %44 = arith.mulf %43, %40 : vector<128x1xf32>
    %c0_11 = arith.constant 0 : index
    %c0_12 = arith.constant 0 : index
    %45 = vector.load %arg5[%c0_11, %c0_12] : memref<32x32xbf16, #tpu.memory_space<vmem>>, vector<32x32xbf16>
    %cst_13 = arith.constant dense<0.000000e+00> : vector<128x32xf32>
    %46 = tpu.matmul %0, %45, %cst_13 {dimension_numbers = #tpu.dot_dimension_numbers<[1], [0], [0], [1], [0, 0, 1, 1], [], []>} : vector<128x32xbf16>, vector<32x32xbf16>, vector<128x32xf32> -> vector<128x32xf32>
    %c0_14 = arith.constant 0 : index
    %c0_15 = arith.constant 0 : index
    %47 = vector.load %arg6[%c0_14, %c0_15] : memref<32x32xbf16, #tpu.memory_space<vmem>>, vector<32x32xbf16>
    %cst_16 = arith.constant dense<0.000000e+00> : vector<128x32xf32>
    %48 = tpu.matmul %1, %47, %cst_16 {dimension_numbers = #tpu.dot_dimension_numbers<[1], [0], [0], [1], [0, 0, 1, 1], [], []>} : vector<128x32xbf16>, vector<32x32xbf16>, vector<128x32xf32> -> vector<128x32xf32>
    %49 = arith.addf %46, %48 : vector<128x32xf32>
    %c0_17 = arith.constant 0 : index
    %c0_18 = arith.constant 0 : index
    %50 = vector.load %arg7[%c0_17, %c0_18] : memref<1x32xf32, #tpu.memory_space<vmem>>, vector<1x32xf32>
    %51 = vector.broadcast %44 : vector<128x1xf32> to vector<128x32xf32>
    %52 = vector.broadcast %50 : vector<1x32xf32> to vector<128x32xf32>
    %53 = arith.mulf %51, %52 : vector<128x32xf32>
    %54 = arith.addf %49, %53 : vector<128x32xf32>
    %c0_19 = arith.constant 0 : index
    %c0_20 = arith.constant 0 : index
    %55 = vector.load %arg8[%c0_19, %c0_20] : memref<1x32xf32, #tpu.memory_space<vmem>>, vector<1x32xf32>
    %56 = vector.broadcast %55 : vector<1x32xf32> to vector<128x32xf32>
    %57 = arith.addf %54, %56 : vector<128x32xf32>
    %cst_21 = arith.constant 0.000000e+00 : f32
    %58 = vector.broadcast %cst_21 : f32 to vector<128x32xf32>
    %59 = arith.maximumf %57, %58 : vector<128x32xf32>
    %60 = arith.truncf %59 : vector<128x32xf32> to vector<128x32xbf16>
    %c0_22 = arith.constant 0 : index
    %c0_23 = arith.constant 0 : index
    %61 = vector.load %arg9[%c0_22, %c0_23] : memref<32x512xbf16, #tpu.memory_space<vmem>>, vector<32x512xbf16>
    %cst_24 = arith.constant dense<0.000000e+00> : vector<128x512xf32>
    %62 = tpu.matmul %60, %61, %cst_24 {dimension_numbers = #tpu.dot_dimension_numbers<[1], [0], [0], [1], [0, 0, 1, 1], [], []>} : vector<128x32xbf16>, vector<32x512xbf16>, vector<128x512xf32> -> vector<128x512xf32>
    %c0_25 = arith.constant 0 : index
    %c0_26 = arith.constant 0 : index
    %63 = vector.load %arg10[%c0_25, %c0_26] : memref<1x512xf32, #tpu.memory_space<vmem>>, vector<1x512xf32>
    %64 = vector.broadcast %63 : vector<1x512xf32> to vector<128x512xf32>
    %65 = arith.addf %62, %64 : vector<128x512xf32>
    %cst_27 = arith.constant 0.000000e+00 : f32
    %66 = vector.broadcast %cst_27 : f32 to vector<128x512xf32>
    %67 = arith.maximumf %65, %66 : vector<128x512xf32>
    %68 = arith.truncf %67 : vector<128x512xf32> to vector<128x512xbf16>
    %c0_28 = arith.constant 0 : index
    %c0_29 = arith.constant 0 : index
    %69 = vector.load %arg11[%c0_28, %c0_29] : memref<512x256xbf16, #tpu.memory_space<vmem>>, vector<512x256xbf16>
    %cst_30 = arith.constant dense<0.000000e+00> : vector<128x256xf32>
    %70 = tpu.matmul %68, %69, %cst_30 {dimension_numbers = #tpu.dot_dimension_numbers<[1], [0], [0], [1], [0, 0, 1, 1], [], []>} : vector<128x512xbf16>, vector<512x256xbf16>, vector<128x256xf32> -> vector<128x256xf32>
    %c0_31 = arith.constant 0 : index
    %c0_32 = arith.constant 0 : index
    %71 = vector.load %arg12[%c0_31, %c0_32] : memref<1x256xf32, #tpu.memory_space<vmem>>, vector<1x256xf32>
    %72 = vector.broadcast %71 : vector<1x256xf32> to vector<128x256xf32>
    %73 = arith.addf %70, %72 : vector<128x256xf32>
    %cst_33 = arith.constant 0.000000e+00 : f32
    %74 = vector.broadcast %cst_33 : f32 to vector<128x256xf32>
    %75 = arith.maximumf %73, %74 : vector<128x256xf32>
    %76 = arith.truncf %75 : vector<128x256xf32> to vector<128x256xbf16>
    %c0_34 = arith.constant 0 : index
    %c0_35 = arith.constant 0 : index
    %77 = vector.load %arg13[%c0_34, %c0_35] : memref<256x8xbf16, #tpu.memory_space<vmem>>, vector<256x8xbf16>
    %cst_36 = arith.constant dense<0.000000e+00> : vector<128x8xf32>
    %78 = tpu.matmul %76, %77, %cst_36 {dimension_numbers = #tpu.dot_dimension_numbers<[1], [0], [0], [1], [0, 0, 1, 1], [], []>} : vector<128x256xbf16>, vector<256x8xbf16>, vector<128x8xf32> -> vector<128x8xf32>
    %c0_37 = arith.constant 0 : index
    %c0_38 = arith.constant 0 : index
    %79 = vector.load %arg14[%c0_37, %c0_38] : memref<1x8xf32, #tpu.memory_space<vmem>>, vector<1x8xf32>
    %80 = vector.broadcast %79 : vector<1x8xf32> to vector<128x8xf32>
    %81 = arith.addf %78, %80 : vector<128x8xf32>
    %c0_39 = arith.constant 0 : index
    %c0_40 = arith.constant 0 : index
    %82 = vector.load %arg15[%c0_39, %c0_40] : memref<128x8xf32, #tpu.memory_space<vmem>>, vector<128x8xf32>
    tpu.vector_store %arg15[%c0_39, %c0_40], %81 {strides = array<i32>} : memref<128x8xf32, #tpu.memory_space<vmem>>, vector<128x8xf32>,
    return
  }
  func.func @transform_0(%arg0: i32) -> i32 {
    %c0_i32 = arith.constant 0 : i32
    %c0_i32_0 = arith.constant 0 : i32
    return %c0_i32 : i32
  }
  func.func @transform_1(%arg0: i32) -> i32 {
    %c0_i32 = arith.constant 0 : i32
    %c0_i32_0 = arith.constant 0 : i32
    return %c0_i32 : i32
  }
  func.func @transform_2(%arg0: i32) -> (i32, i32) {
    %c0_i32 = arith.constant 0 : i32
    %c0_i32_0 = arith.constant 0 : i32
    return %arg0, %c0_i32 : i32, i32
  }
  func.func @transform_3(%arg0: i32) -> (i32, i32) {
    %c0_i32 = arith.constant 0 : i32
    %c0_i32_0 = arith.constant 0 : i32
    return %arg0, %c0_i32 : i32, i32
  }
  func.func @transform_4(%arg0: i32) -> (i32, i32) {
    %c0_i32 = arith.constant 0 : i32
    %c0_i32_0 = arith.constant 0 : i32
    %c0_i32_1 = arith.constant 0 : i32
    return %c0_i32, %c0_i32_0 : i32, i32
  }
  func.func @transform_5(%arg0: i32) -> (i32, i32) {
    %c0_i32 = arith.constant 0 : i32
    %c0_i32_0 = arith.constant 0 : i32
    %c0_i32_1 = arith.constant 0 : i32
    return %c0_i32, %c0_i32_0 : i32, i32
  }
  func.func @transform_6(%arg0: i32) -> (i32, i32) {
    %c0_i32 = arith.constant 0 : i32
    %c0_i32_0 = arith.constant 0 : i32
    %c0_i32_1 = arith.constant 0 : i32
    return %c0_i32, %c0_i32_0 : i32, i32
  }
  func.func @transform_7(%arg0: i32) -> (i32, i32) {
    %c0_i32 = arith.constant 0 : i32
    %c0_i32_0 = arith.constant 0 : i32
    %c0_i32_1 = arith.constant 0 : i32
    return %c0_i32, %c0_i32_0 : i32, i32
  }
  func.func @transform_8(%arg0: i32) -> (i32, i32) {
    %c0_i32 = arith.constant 0 : i32
    %c0_i32_0 = arith.constant 0 : i32
    %c0_i32_1 = arith.constant 0 : i32
    return %c0_i32, %c0_i32_0 : i32, i32
  }
  func.func @transform_9(%arg0: i32) -> (i32, i32) {
    %c0_i32 = arith.constant 0 : i32
    %c0_i32_0 = arith.constant 0 : i32
    %c0_i32_1 = arith.constant 0 : i32
    return %c0_i32, %c0_i32_0 : i32, i32
  }
  func.func @transform_10(%arg0: i32) -> (i32, i32) {
    %c0_i32 = arith.constant 0 : i32
    %c0_i32_0 = arith.constant 0 : i32
    %c0_i32_1 = arith.constant 0 : i32
    return %c0_i32, %c0_i32_0 : i32, i32
  }
  func.func @transform_11(%arg0: i32) -> (i32, i32) {
    %c0_i32 = arith.constant 0 : i32
    %c0_i32_0 = arith.constant 0 : i32
    %c0_i32_1 = arith.constant 0 : i32
    return %c0_i32, %c0_i32_0 : i32, i32
  }
  func.func @transform_12(%arg0: i32) -> (i32, i32) {
    %c0_i32 = arith.constant 0 : i32
    %c0_i32_0 = arith.constant 0 : i32
    %c0_i32_1 = arith.constant 0 : i32
    return %c0_i32, %c0_i32_0 : i32, i32
  }
  func.func @transform_13(%arg0: i32) -> (i32, i32) {
    %c0_i32 = arith.constant 0 : i32
    %c0_i32_0 = arith.constant 0 : i32
    %c0_i32_1 = arith.constant 0 : i32
    return %c0_i32, %c0_i32_0 : i32, i32
  }
  func.func @transform_14(%arg0: i32) -> (i32, i32) {
    %c0_i32 = arith.constant 0 : i32
    %c0_i32_0 = arith.constant 0 : i32
    return %arg0, %c0_i32 : i32, i32
  }
}

</mosaic_0001>

<bundles_post_ra>
// kernel: tpu_custom_call.1
= control target key start
LH: loop header
LB: loop body
LE: loop exit
PB: predicated region body
PF: predicated region fallthrough
CT: control target
= control target key end

     0   :  { %6 = vsyncpa [#allocation3], 0  ;;  %s103_s0 = inlined_call_operand.hbm [shape: f32[8,128], index: 0, kind: input, shape index: {}]   ;;  %s104_s1 = inlined_call_operand.hbm [shape: f32[8,128], index: 1, kind: output, shape index: {}]  }
   0x1   :  { %7 = vsyncpa [#allocation4], 0  ;;  %s85_s6 = smov [#allocation2]  }
   0x2   :  { %s14_s7 = sshll.u32 %s85_s6, 4  ;;  %s15_s7 = int_to_ptr.vmem [resolvable:$true] %s14_s7 }
   0x3   :  { %s49_s8 = scalar_lea.vmem %s15_s7, 128  ;;  %p54_p1 = scmp.lt.s32.totalorder %s15_s7, %s15_s7 }
   0x4   :  { %p50_p0 = scmp.ne.s32.totalorder %s15_s7, %s49_s8  ;;  %p55_p2 = scmp.lt.s32.totalorder %s49_s8, %s49_s8 }
   0x6   :  { %p56_p3 = por %p55_p2, %p54_p1 }
   0x8   :  { %p57_p4 = pnand %p56_p3, %p50_p0 }
   0xa   :  { %60 = shalt.err (!%p57_p4)
}
   0xb   :  { %17 = dma.hbm_to_vmem [thread:$0]  %s103_s0, 128, %s15_s7, [#allocation3]  }
   0xc   :  { %81 = dma.done.wait [#allocation3], 128  }
   0xd   :  { %82 = vsyncadd [#allocation3], 4294967168  ;;  %s86_s11 = smov [#allocation5]   ;;  %v21_v0 = vld [vmem:[#allocation2] sm:$0xff] }
   0xe   :  { %s30_s12 = sshll.u32 %s86_s11, 4  ;;  %v22_v1 = vadd.f32 1.0, %v21_v0  ;;  %s31_s12 = int_to_ptr.vmem [resolvable:$true] %s30_s12 }
   0xf   :  { %s61_s13 = scalar_lea.vmem %s31_s12, 128  ;;  %p66_p6 = scmp.lt.s32.totalorder %s31_s12, %s31_s12 }
  0x10   :  { %23 = vst [vmem:[#allocation5] sm:$0xff] %v22_v1  ;;  %p62_p5 = scmp.ne.s32.totalorder %s31_s12, %s61_s13  ;;  %p67_p7 = scmp.lt.s32.totalorder %s61_s13, %s61_s13 }
  0x12   :  { %p68_p8 = por %p67_p7, %p66_p6 }
  0x14   :  { %p69_p9 = pnand %p68_p8, %p62_p5 }
  0x16   :  { %72 = shalt.err (!%p69_p9)
}
  0x17   :  { %33 = dma.vmem_to_hbm [thread:$0]  %s31_s12, 128, %s104_s1, [#allocation4]  }
  0x18   :  { %83 = dma.done.wait [#allocation4], 128  }
  0x19   :  { %84 = vsyncadd [#allocation4], 4294967168 }
  0x1a   :  { %37 = vsyncpa [#allocation3], 1 }
  0x1b   :  { %38 = vsyncpa [#allocation4], 1 }

// kernel: device_forward.2
= control target key start
LH: loop header
LB: loop body
LE: loop exit
PB: predicated region body
PF: predicated region fallthrough
CT: control target
= control target key end

     0   :  { %7 = vsyncpa [#allocation3], 0  ;;  %s473_s9 = smov 0   ;;  %s519_s0 = inlined_call_operand.vmem [shape: s32[2], index: 0, kind: input, shape index: {}]   ;;  %s520_s1 = inlined_call_operand.vmem [shape: bf16[2,8,32], index: 1, kind: input, shape index: {}]   ;;  %s521_s2 = inlined_call_operand.vmem [shape: f32[2,8,128], index: 2, kind: output, shape index: {}]  }
   0x1 LB: > { %s479_s10 = sadd.s32 4294967295, %s452_s9   ;;  %p365_p0 = scmp.ge.s32.totalorder %s452_s9, 1  ;;  %s452_s9 = sphi %s473_s9, %s13_s9  }
   0x2   : > { %p91_p1 = scmp.lt.s32.totalorder %s452_s9, 3  ;;  %s104_s13 = sshll.u32 %s519_s0, 4  ;;  %s105_s13 = int_to_ptr.vmem [resolvable:$true] %s104_s13 }
   0x3   : > { %p403_p3 = scmp.eq.s32.totalorder %s479_s10, 0  ;;  %s427_s15 = scalar_lea.vmem %s105_s13, 16 }
   0x4   : > { %p486_p2 = pnand %p365_p0, %p91_p1  ;;  %p428_p6 = scmp.ne.s32.totalorder %s105_s13, %s427_s15 }
   0x5   : > { %p435_p10 = scmp.lt.s32.totalorder %s105_s13, %s105_s13  ;;  %p436_p11 = scmp.lt.s32.totalorder %s427_s15, %s427_s15 }
   0x6   : > { %p399_p4 = pneg %p486_p2 }
   0x7   : > { %p437_p12 = por %p436_p11, %p435_p10 }
   0x8   : > { %p400_p5 = pnand %p403_p3, %p399_p4 }
   0xa   : > { %p429_p7 = pneg %p400_p5 }
   0xc   : > { %p430_p8 = pnand %p429_p7, %p428_p6 }
   0xe   : > { %p431_p9 = pneg %p430_p8 }
  0x10   : > { %p438_p13 = pnand %p437_p12, %p431_p9 }
  0x12   : > { %441 = shalt.err (!%p438_p13)
}
  0x13   : > { %s454_s16 = smov [#allocation2]   ;;  %124 = sbr.rel (%p486_p2) target bundleno = 895 (0x37f), region = 28 }
  0x14   : > { %402 = dma.vmem_to_smem (!%p400_p5), %s105_s13, 16, %s454_s16, [#allocation3]  }
  0x18   : > { %447 = dma.done.wait (%p403_p3), [#allocation3], 16  }
  0x19   : > { %449 = vsyncadd (%p403_p3), [#allocation3], 4294967280 }
  0x1a   : > { %130 = sfence }
  0x1b   : > { %p145_p0 = scmp.lt.s32.totalorder %s479_s10, 1  ;;  %vm157_vm0 = vcmask 261120   ;;  %v455_v4 = vmov 0.0   ;;  %vm456_vm1 = vmmov 0   ;;  %s153_s22 = sld [smem:[#allocation2 + %s479_s10]]  ;;  %v237_v9 = vlaneseq }
  0x1c   : > { %380 = vmatprep.subr.mxu0 %v455_v4  ;;  %382 = vmatprep.mubr.msk.f32.mxu0 %vm456_vm1, %v455_v4  ;;  %vm250_vm5 = vcmask 64512   ;;  %s457_s29 = smov 1.0  }
  0x1d   : > { %s503_s17 = scalar_select %p145_p0, %s479_s10, 1  ;;  %v238_v10 = vshrl.u32 %v237_v9, 7  ;;  %v240_v11 = vand.u32 127, %v237_v9 }
  0x1f   : > { %s370_s18 = sshll.u32 %s503_s17, 2  ;;  %s371_s8 = sshll.u32 %s503_s17, 3 }
  0x20   : > { %s148_s21 = scalar_lea.vmem %s520_s1, %s370_s18  ;;  %s152_s12 = scalar_lea.vmem %s521_s2, %s371_s8 }
  0x21   : > { %v154_v0 = vld [vmem:[%s148_s21] sm:$0xf]  ;;  %v241_v12 = vstv %s153_s22  ;;  %s247_s23 = smul.u32 %s153_s22, %s153_s22 }
  0x22   : > { %v155_v1 = vunpack.c.l.bf16 %v154_v0  ;;  %vm242_vm2 = vcmp.lt.s32.totalorder %v238_v10, %v241_v12  ;;  %vm243_vm3 = vcmp.lt.s32.totalorder %v240_v11, %v241_v12 }
  0x23   : > { %vm244_vm4 = vmand %vm242_vm2, %vm243_vm3  ;;  %s248_s24 = scvt.s32.f32 %s247_s23 }
  0x24   : > { %v156_v2 = vmul.f32 %v155_v1, %v155_v1  ;;  %v374_v13 = vsel %vm244_vm4, 1.0, %v455_v4 }
  0x25   : > { %v261_v18 = vstv %s248_s24  ;;  %s375_s28 = sadd.f32 -1.0, %s248_s24 }
  0x26   : > { %v158_v3 = vsel %vm157_vm0, %v156_v2, 0.0 }
  0x27   : > { %159 = vadd.xlane.f32.xlu0 %v158_v3  ;;  %s280_s30 = smax.f32 %s457_s29, %s375_s28 }
  0x28   : > { %v281_v32 = vstv %s280_s30 }
  0xb0   : > { %v160_v5 = vpop.xlane.xlu0 %159 }
  0xb1   : > { %v161_v6 = vmax.f32 %v160_v5, 1e-16 }
  0xb3   : > { %417 = vrsqrt.f32 %v161_v6 }
  0xb4   : > { %419 = vrcp.f32 %v261_v18 }
  0xb5   : > { %421 = vrcp.f32 %v281_v32 }
  0xc0   : > { %v418_v7 = vpop.eup %417 }
  0xc1   : > { %v163_v8 = vmul.f32 %v418_v7, %v155_v1  ;;  %v420_v25 = vpop.eup %419 }
  0xc2   : > { %v422_v39 = vpop.eup %421 }
  0xc3   : > { %381 = vmatpush3.xpose.msk.msra.mxu0 %vm157_vm0, %v163_v8 }
  0xc6   : > { %383 = vmatmul.mubr.msk.f32.vlgmr.msra.gmra.mxu0 %vm157_vm0, %v163_v8 }
 0x186   : > { %v233_v14 = vpop.f32.mrf.mxu0 }
 0x187   : > { %v249_v15 = vmul.f32 %v374_v13, %v233_v14 }
 0x188   : > { %v384_v16 = vpop.f32.mrf.mxu0 }
 0x189   : > { %v251_v17 = vsel %vm250_vm5, %v249_v15, 0.0 }
 0x18a   : > { %252 = vadd.xlane.f32.xlu0 %v251_v17 }
 0x213   : > { %v253_v19 = vpop.xlane.xlu0 %252 }
 0x214   : > { %v254_v20 = vrot.slane %v253_v19, 4 }
 0x216   : > { %v255_v21 = vadd.f32 %v254_v20, %v253_v19 }
 0x218   : > { %v256_v22 = vrot.slane %v255_v21, 2 }
 0x21a   : > { %v257_v23 = vadd.f32 %v256_v22, %v255_v21 }
 0x21c   : > { %v258_v24 = vrot.slane %v257_v23, 1 }
 0x21e   : > { %v259_v26 = vadd.f32 %v258_v24, %v257_v23 }
 0x220   : > { %385 = vpush %v259_v26 }
 0x221   : > { %387 = vpush %v420_v25 }
 0x251   : > { %s386_s25 = spop %385 }
 0x252   : > { %s388_s26 = spop %387 }
 0x253   : > { %s264_s27 = smul.f32 %s388_s26, %s386_s25 }
 0x255   : > { %v265_v27 = vstv %s264_s27 }
 0x256   : > { %v266_v28 = vsub.f32 %v233_v14, %v265_v27 }
 0x258   : > { %v267_v29 = vmul.f32 %v374_v13, %v266_v28 }
 0x25a   : > { %v268_v30 = vmul.f32 %v267_v29, %v267_v29 }
 0x25c   : > { %v269_v31 = vsel %vm250_vm5, %v268_v30, 0.0 }
 0x25d   : > { %270 = vadd.xlane.f32.xlu1 %v269_v31 }
 0x2e6   : > { %v271_v33 = vpop.xlane.xlu1 %270 }
 0x2e7   : > { %v272_v34 = vrot.slane %v271_v33, 4 }
 0x2e9   : > { %v273_v35 = vadd.f32 %v272_v34, %v271_v33 }
 0x2eb   : > { %v274_v36 = vrot.slane %v273_v35, 2 }
 0x2ed   : > { %v275_v37 = vadd.f32 %v274_v36, %v273_v35 }
 0x2ef   : > { %v276_v38 = vrot.slane %v275_v37, 1 }
 0x2f1   : > { %v277_v40 = vadd.f32 %v276_v38, %v275_v37 }
 0x2f3   : > { %389 = vpush %v277_v40 }
 0x2f4   : > { %391 = vpush %v422_v39 }
 0x324   : > { %s390_s3 = spop %389 }
 0x325   : > { %s392_s4 = spop %391 }
 0x326   : > { %s284_s5 = smul.f32 %s392_s4, %s390_s3 }
 0x328   : > { %v285_v41 = vstv %s284_s5 }
 0x329   : > { %423 = vrsqrt.f32 %v285_v41  ;;  %vm288_vm6 = vcmp.eq.f32.partialorder %v285_v41, inf  ;;  %v291_v44 = vand.u32 2147483648, %v285_v41  ;;  %vm290_vm7 = vcmp.eq.f32.partialorder %v285_v41, 0.0 }
 0x336   : > { %v424_v42 = vpop.eup %423 }
 0x337   : > { %v287_v43 = vmul.f32 %v424_v42, %v285_v41 }
 0x339   : > { %v289_v45 = vsel %vm288_vm6, %v285_v41, %v287_v43 }
 0x33a   : > { %v292_v46 = vsel %vm290_vm7, %v291_v44, %v289_v45 }
 0x33b   : > { %393 = vpush %v292_v46 }
 0x36c   : > { %s394_s6 = spop %393 }
 0x36d   : > { %s294_s7 = sadd.f32 1e-05, %s394_s6 }
 0x36f   : > { %v295_v47 = vstv %s294_s7 }
 0x370   : > { %425 = vrcp.f32 %v295_v47 }
 0x37d   : > { %v426_v48 = vpop.eup %425 }
 0x37e   : > { %297 = vst [vmem:[%s152_s12] sm:$0xff] %v426_v48 }
 0x37f PF: > { %s13_s9 = sadd.s32 1, %s452_s9  }
 0x380   : > { %p10_p1 = scmp.ge.s32.totalorder %s13_s9, 4  }
 0x382   :  { %12 = sbr.rel (!%p10_p1) target bundleno = 1 (0x1), region = 63 }
 0x387   :  { %317 = vsyncpa [#allocation3], 1 }
 0x388   :  { %319 = vsyncpa [#allocation3 + $0x1], 1 }

// kernel: device_forward.3
= control target key start
LH: loop header
LB: loop body
LE: loop exit
PB: predicated region body
PF: predicated region fallthrough
CT: control target
= control target key end

     0   :  { %20 = vsyncpa [#allocation4], 0  ;;  %s3941_s0 = inlined_call_operand.vmem [shape: f32[2], index: 0, kind: input, shape index: {}]   ;;  %s3942_s1 = inlined_call_operand.<no memory space> [shape: f32[1], index: 1, kind: input, shape index: {}]   ;;  %s3943_s2 = inlined_call_operand.vmem [shape: bf16[128,32], index: 2, kind: input, shape index: {}]   ;;  %s3944_s3 = inlined_call_operand.vmem [shape: bf16[128,32], index: 3, kind: input, shape index: {}]   ;;  %s3945_s4 = inlined_call_operand.vmem [shape: bf16[32,32], index: 4, kind: input, shape index: {}]   ;;  %s3946_s5 = inlined_call_operand.vmem [shape: bf16[32,32], index: 5, kind: input, shape index: {}]   ;;  %s3947_s6 = inlined_call_operand.vmem [shape: f32[1,32], index: 6, kind: input, shape index: {}]   ;;  %s3948_s7 = inlined_call_operand.vmem [shape: f32[1,32], index: 7, kind: input, shape index: {}]   ;;  %s3949_s8 = inlined_call_operand.vmem [shape: bf16[32,512], index: 8, kind: input, shape index: {}]   ;;  %s3950_s9 = inlined_call_operand.vmem [shape: f32[1,512], index: 9, kind: input, shape index: {}]   ;;  %s3951_s10 = inlined_call_operand.vmem [shape: bf16[512,256], index: 10, kind: input, shape index: {}]   ;;  %s3952_s11 = inlined_call_operand.vmem [shape: f32[1,256], index: 11, kind: input, shape index: {}]   ;;  %s3953_s12 = inlined_call_operand.vmem [shape: bf16[256,8], index: 12, kind: input, shape index: {}]   ;;  %s3954_s13 = inlined_call_operand.vmem [shape: f32[1,8], index: 13, kind: input, shape index: {}]   ;;  %s3955_s14 = inlined_call_operand.vmem [shape: f32[128,8], index: 14, kind: output, shape index: {}]  }
   0x1   :  { %s27_s15 = sshll.u32 %s3941_s0, 4  ;;  %s28_s15 = int_to_ptr.vmem [resolvable:$true] %s27_s15 }
   0x2   :  { %s2842_s16 = scalar_lea.vmem %s28_s15, 16  ;;  %p2847_p1 = scmp.lt.s32.totalorder %s28_s15, %s28_s15 }
   0x3   :  { %p2843_p0 = scmp.ne.s32.totalorder %s28_s15, %s2842_s16  ;;  %p2848_p2 = scmp.lt.s32.totalorder %s2842_s16, %s2842_s16 }
   0x5   :  { %p2849_p3 = por %p2848_p2, %p2847_p1 }
   0x7   :  { %p2850_p4 = pnand %p2849_p3, %p2843_p0 }
   0x9   :  { %2853 = shalt.err (!%p2850_p4)
}
   0xa   :  { %s2856_s17 = smov [#allocation3]  }
   0xb   :  { %30 = dma.vmem_to_smem %s28_s15, 16, %s2856_s17, [#allocation4]  }
   0xc   :  { %2854 = dma.done.wait [#allocation4], 16  }
   0xd   :  { %2855 = vsyncadd [#allocation4], 4294967280 }
   0xe   :  { %60 = sfence }
   0xf   :  { %v2650_v0 = vld [vmem:[%s3946_s5 + $0x8] sm:$0xff]   ;;  %v2651_v1 = vld [vmem:[%s3946_s5] sm:$0xff]   ;;  %vm142_vm0 = vcmask 261120   ;;  %v82_v6 = vld [vmem:[%s3944_s3 + $0x10] sm:$0xff]   ;;  %s482_s18 = sld [smem:[#allocation3]]  ;;  %vm2358_vm4 = vcmask 64512  }
  0x10   :  { %2608 = vmatprep.subr.bf16.mxu1 %v2650_v0  ;;  %v78_v2 = vld [vmem:[%s3944_s3] sm:$0xff]   ;;  %v80_v5 = vld [vmem:[%s3944_s3 + $0x8] sm:$0xff]   ;;  %v84_v21 = vld [vmem:[%s3944_s3 + $0x18] sm:$0xff]   ;;  %v3031_v39 = vunpack.c.h.bf16 %v82_v6  ;;  %v3044_v43 = vunpack.c.l.bf16 %v82_v6  ;;  %s3298_s19 = sld [smem:[#allocation3 + $0x1]] }
  0x11   :  { %2609 = vmatpush3.bf16.msra.mxu1 %v2650_v0  ;;  %v2945_v3 = vunpack.c.l.bf16 %v78_v2  ;;  %v2947_v4 = vunpack.c.h.bf16 %v78_v2  ;;  %v2654_v7 = vld [vmem:[%s3945_s4 + $0x8] sm:$0xff]   ;;  %v2961_v8 = vld [vmem:[%s3943_s2] sm:$0xff]   ;;  %2612 = vmatprep.mubr.msk.bf16.mxu1 %vm142_vm0, %v78_v2  ;;  %v2994_v23 = vunpack.c.h.bf16 %v80_v5  ;;  %v3007_v26 = vld [vmem:[%s3943_s2 + $0x10] sm:$0xff]   ;;  %v112_v29 = vunpack.c.l.bf16 %v80_v5 }
  0x12   :  { %2610 = vmatprep.subr.bf16.mxu1 %v2651_v1  ;;  %v2965_v9 = vunpack.c.l.bf16 %v2961_v8  ;;  %v95_v11 = vunpack.c.h.bf16 %v2961_v8  ;;  %v2973_v12 = vld [vmem:[%s3943_s2 + $0x8] sm:$0xff]   ;;  %v2660_v18 = vld [vmem:[%s3945_s4] sm:$0xff]   ;;  %v3017_v32 = vunpack.c.h.bf16 %v3007_v26  ;;  %v3021_v35 = vunpack.c.l.bf16 %v3007_v26  ;;  %v3037_v40 = vld [vmem:[%s3944_s3 + $0x30] sm:$0xff]  }
  0x13   :  { %v271_v10 = vmul.f32 %v2945_v3, %v2945_v3  ;;  %v272_v13 = vmul.f32 %v2947_v4, %v2947_v4  ;;  %v2981_v17 = vunpack.c.l.bf16 %v2973_v12  ;;  %v2987_v19 = vunpack.c.h.bf16 %v2973_v12  ;;  %v3000_v24 = vld [vmem:[%s3944_s3 + $0x20] sm:$0xff]   ;;  %v3026_v36 = vld [vmem:[%s3944_s3 + $0x28] sm:$0xff]   ;;  %v68_v46 = vld [vmem:[%s3943_s2 + $0x18] sm:$0xff]  }
  0x14   :  { %v191_v14 = vmul.f32 %v2965_v9, %v2965_v9  ;;  %v192_v16 = vmul.f32 %v95_v11, %v95_v11  ;;  %v274_v31 = vmul.f32 %v2994_v23, %v2994_v23  ;;  %v273_v34 = vmul.f32 %v112_v29, %v112_v29  ;;  %v3058_v49 = vld [vmem:[%s3944_s3 + $0x38] sm:$0xff]   ;;  %v70_v2 = vld [vmem:[%s3943_s2 + $0x20] sm:$0xff]  }
  0x15   :  { %2611 = vmatpush3.bf16.msra.mxu1 %v2651_v1  ;;  %v287_v15 = vsel %vm142_vm0, %v271_v10, 0.0  ;;  %v290_v22 = vsel %vm142_vm0, %v272_v13, 0.0  ;;  %v194_v25 = vmul.f32 %v2987_v19, %v2987_v19  ;;  %v193_v28 = vmul.f32 %v2981_v17, %v2981_v17 }
  0x16   :  { %2628 = vmatprep.subr.bf16.mxu1 %v2654_v7  ;;  %288 = vadd.xlane.f32.xlu1 %v287_v15  ;;  %v207_v20 = vsel %vm142_vm0, %v191_v14, 0.0  ;;  %v210_v27 = vsel %vm142_vm0, %v192_v16, 0.0  ;;  %v296_v37 = vsel %vm142_vm0, %v274_v31, 0.0  ;;  %v196_v38 = vmul.f32 %v3017_v32, %v3017_v32 }
  0x17   :  { %208 = vadd.xlane.f32.xlu0 %v207_v20  ;;  %v216_v30 = vsel %vm142_vm0, %v194_v25, 0.0  ;;  %v213_v33 = vsel %vm142_vm0, %v193_v28, 0.0  ;;  %v293_v41 = vsel %vm142_vm0, %v273_v34, 0.0  ;;  %v195_v42 = vmul.f32 %v3021_v35, %v3021_v35 }
  0x18   :  { %2613 = vmatmul.mubr.msk.bf16.vlgmr.msra.gmra.mxu1 %vm142_vm0, %v80_v5  ;;  %v222_v44 = vsel %vm142_vm0, %v196_v38, 0.0  ;;  %v276_v45 = vmul.f32 %v3031_v39, %v3031_v39  ;;  %v275_v48 = vmul.f32 %v3044_v43, %v3044_v43  ;;  %v127_v51 = vmul.f32 %v2947_v4, %v95_v11 }
  0x19   :  { %2629 = vmatpush3.bf16.msra.mxu1 %v2654_v7  ;;  %2616 = vmatprep.mubr.msk.bf16.mxu1 %vm142_vm0, %v82_v6  ;;  %v219_v47 = vsel %vm142_vm0, %v195_v42, 0.0  ;;  %v3062_v52 = vunpack.c.h.bf16 %v68_v46  ;;  %v126_v54 = vmul.f32 %v2945_v3, %v2965_v9  ;;  %v3071_v55 = vunpack.c.l.bf16 %v68_v46 }
  0x1a   :  { %291 = vadd.xlane.f32.xlu1 %v290_v22  ;;  %2630 = vmatprep.subr.bf16.mxu1 %v2660_v18  ;;  %v302_v50 = vsel %vm142_vm0, %v276_v45, 0.0  ;;  %v299_v53 = vsel %vm142_vm0, %v275_v48, 0.0  ;;  %v146_v56 = vsel %vm142_vm0, %v127_v51, 0.0  ;;  %v3076_v58 = vunpack.c.h.bf16 %v84_v21 }
  0x1b   :  { %211 = vadd.xlane.f32.xlu0 %v210_v27  ;;  %v198_v57 = vmul.f32 %v3062_v52, %v3062_v52  ;;  %v143_v59 = vsel %vm142_vm0, %v126_v54, 0.0  ;;  %v197_v60 = vmul.f32 %v3071_v55, %v3071_v55  ;;  %v3081_v61 = vunpack.c.l.bf16 %v84_v21 }
  0x1c   :  { %v278_v63 = vmul.f32 %v3076_v58, %v3076_v58  ;;  %v128_v3 = vmul.f32 %v112_v29, %v2981_v17  ;;  %v129_v4 = vmul.f32 %v2994_v23, %v2987_v19  ;;  %v3100_v6 = vunpack.c.h.bf16 %v70_v2  ;;  %v72_v19 = vld [vmem:[%s3943_s2 + $0x28] sm:$0xff]  }
  0x1d   :  { %2631 = vmatpush3.bf16.msra.mxu1 %v2660_v18  ;;  %v228_v62 = vsel %vm142_vm0, %v198_v57, 0.0  ;;  %v225_v0 = vsel %vm142_vm0, %v197_v60, 0.0  ;;  %v277_v1 = vmul.f32 %v3081_v61, %v3081_v61  ;;  %v3102_v7 = vunpack.c.l.bf16 %v70_v2 }
  0x1e   :  { %217 = vadd.xlane.f32.xlu1 %v216_v30  ;;  %v308_v5 = vsel %vm142_vm0, %v278_v63, 0.0  ;;  %v149_v9 = vsel %vm142_vm0, %v128_v3, 0.0  ;;  %v152_v10 = vsel %vm142_vm0, %v129_v4, 0.0  ;;  %v200_v11 = vmul.f32 %v3100_v6, %v3100_v6 }
  0x1f   :  { %214 = vadd.xlane.f32.xlu0 %v213_v33  ;;  %v3110_v13 = vunpack.c.h.bf16 %v3000_v24  ;;  %v199_v14 = vmul.f32 %v3102_v7, %v3102_v7  ;;  %v3119_v15 = vunpack.c.l.bf16 %v3000_v24  ;;  %v3133_v22 = vunpack.c.h.bf16 %v72_v19 }
  0x20   :  { %2617 = vmatmul.mubr.msk.bf16.gmra.mxu1 %vm142_vm0, %v84_v21  ;;  %v234_v16 = vsel %vm142_vm0, %v200_v11, 0.0  ;;  %v131_v21 = vmul.f32 %v3031_v39, %v3017_v32  ;;  %v3140_v25 = vunpack.c.l.bf16 %v72_v19  ;;  %v121_v29 = vunpack.c.h.bf16 %v3026_v36 }
  0x21   :  { %2620 = vmatprep.mubr.msk.bf16.mxu1 %vm142_vm0, %v3000_v24  ;;  %v280_v17 = vmul.f32 %v3110_v13, %v3110_v13  ;;  %v231_v18 = vsel %vm142_vm0, %v199_v14, 0.0  ;;  %v130_v24 = vmul.f32 %v3044_v43, %v3021_v35  ;;  %v202_v28 = vmul.f32 %v3133_v22, %v3133_v22  ;;  %v76_v35 = vld [vmem:[%s3943_s2 + $0x38] sm:$0xff]  }
  0x22   :  { %297 = vadd.xlane.f32.xlu1 %v296_v37  ;;  %v158_v27 = vsel %vm142_vm0, %v131_v21, 0.0  ;;  %v201_v31 = vmul.f32 %v3140_v25, %v3140_v25  ;;  %v120_v32 = vunpack.c.l.bf16 %v3026_v36  ;;  %v282_v34 = vmul.f32 %v121_v29, %v121_v29 }
  0x23   :  { %294 = vadd.xlane.f32.xlu0 %v293_v41  ;;  %v314_v20 = vsel %vm142_vm0, %v280_v17, 0.0  ;;  %v155_v30 = vsel %vm142_vm0, %v130_v24, 0.0  ;;  %v240_v33 = vsel %vm142_vm0, %v202_v28, 0.0  ;;  %v132_v43 = vmul.f32 %v3081_v61, %v3071_v55  ;;  %v2673_v24 = vld [vmem:[%s3949_s8 + $0x8] ss:$16 sps:$4 sm:$0xff]  }
  0x24   :  { %v237_v37 = vsel %vm142_vm0, %v201_v31, 0.0  ;;  %v281_v38 = vmul.f32 %v120_v32, %v120_v32  ;;  %v320_v39 = vsel %vm142_vm0, %v282_v34, 0.0  ;;  %v122_v51 = vunpack.c.l.bf16 %v3037_v40 }
  0x25   :  { %v161_v48 = vsel %vm142_vm0, %v132_v43, 0.0  ;;  %v135_v57 = vmul.f32 %v3110_v13, %v3100_v6  ;;  %v108_v60 = vunpack.c.l.bf16 %v76_v35  ;;  %v125_v63 = vunpack.c.h.bf16 %v3058_v49 }
  0x26   :  { %223 = vadd.xlane.f32.xlu1 %v222_v44  ;;  %v317_v42 = vsel %vm142_vm0, %v281_v38, 0.0  ;;  %v283_v55 = vmul.f32 %v122_v51, %v122_v51  ;;  %v2857_v28 = vmov 0  }
  0x27   :  { %220 = vadd.xlane.f32.xlu0 %v219_v47  ;;  %v123_v47 = vunpack.c.h.bf16 %v3037_v40  ;;  %v170_v61 = vsel %vm142_vm0, %v135_v57, 0.0  ;;  %v286_v4 = vmul.f32 %v125_v63, %v125_v63  ;;  %1166 = vmatprep.mubr.bf16.mxu0 %v2857_v28 }
  0x28   :  { %2621 = vmatmul.mubr.msk.bf16.gmra.mxu1 %vm142_vm0, %v3026_v36  ;;  %v133_v36 = vmul.f32 %v3076_v58, %v3062_v52  ;;  %v109_v58 = vunpack.c.h.bf16 %v76_v35 }
  0x29   :  { %2624 = vmatprep.mubr.msk.bf16.mxu1 %vm142_vm0, %v3037_v40  ;;  %v134_v40 = vmul.f32 %v3119_v15, %v3102_v7  ;;  %v332_v7 = vsel %vm142_vm0, %v286_v4, 0.0 }
  0x2a   :  { %303 = vadd.xlane.f32.xlu1 %v302_v50  ;;  %v164_v45 = vsel %vm142_vm0, %v133_v36, 0.0 }
  0x2b   :  { %300 = vadd.xlane.f32.xlu0 %v299_v53  ;;  %v284_v53 = vmul.f32 %v123_v47, %v123_v47 }
  0x2e   :  { %147 = vadd.xlane.f32.xlu1 %v146_v56  ;;  %v326_v56 = vsel %vm142_vm0, %v284_v53, 0.0 }
  0x2f   :  { %144 = vadd.xlane.f32.xlu0 %v143_v59  ;;  %v323_v59 = vsel %vm142_vm0, %v283_v55, 0.0 }
  0x30   :  { %2625 = vmatmul.mubr.msk.bf16.gmra.mxu1 %vm142_vm0, %v3058_v49 }
  0x31   :  { %2632 = vmatprep.mubr.msk.bf16.mxu1 %vm142_vm0, %v2961_v8  ;;  %v305_v8 = vsel %vm142_vm0, %v277_v1, 0.0  ;;  %v205_v1 = vmul.f32 %v108_v60, %v108_v60 }
  0x32   :  { %229 = vadd.xlane.f32.xlu1 %v228_v62  ;;  %v206_v62 = vmul.f32 %v109_v58, %v109_v58 }
  0x33   :  { %226 = vadd.xlane.f32.xlu0 %v225_v0  ;;  %v167_v0 = vsel %vm142_vm0, %v134_v40, 0.0 }
  0x34   :  { %v252_v3 = vsel %vm142_vm0, %v206_v62, 0.0 }
  0x36   :  { %309 = vadd.xlane.f32.xlu1 %v308_v5  ;;  %v249_v5 = vsel %vm142_vm0, %v205_v1, 0.0 }
  0x37   :  { %306 = vadd.xlane.f32.xlu0 %v305_v8  ;;  %v137_v8 = vmul.f32 %v121_v29, %v3133_v22  ;;  %v2676_v22 = vld [vmem:[%s3949_s8 + $0x24] ss:$16 sps:$4 sm:$0xff]  }
  0x38   :  { %2633 = vmatmul.mubr.msk.bf16.vlgmr.msra.gmra.mxu1 %vm142_vm0, %v2973_v12  ;;  %v279_v12 = vmul.f32 %v3119_v15, %v3119_v15  ;;  %v2670_v15 = vld [vmem:[%s3949_s8 + $0x28] ss:$16 sps:$4 sm:$0xff]   ;;  %1146 = vmatprep.subr.bf16.mxu0 %v2676_v22 }
  0x39   :  { %2636 = vmatprep.mubr.msk.bf16.mxu1 %vm142_vm0, %v3007_v26  ;;  %v74_v26 = vld [vmem:[%s3943_s2 + $0x30] sm:$0xff]  }
  0x3a   :  { %153 = vadd.xlane.f32.xlu1 %v152_v10  ;;  %v311_v23 = vsel %vm142_vm0, %v279_v12, 0.0  ;;  %v107_v41 = vunpack.c.h.bf16 %v74_v26  ;;  %v106_v44 = vunpack.c.l.bf16 %v74_v26  ;;  %v136_v10 = vmul.f32 %v120_v32, %v3140_v25  ;;  %v2675_v25 = vld [vmem:[%s3949_s8 + $0xc] ss:$16 sps:$4 sm:$0xff]  }
  0x3b   :  { %150 = vadd.xlane.f32.xlu0 %v149_v9 }
  0x3c   :  { %v203_v50 = vmul.f32 %v106_v44, %v106_v44  ;;  %v139_v11 = vmul.f32 %v123_v47, %v107_v41  ;;  %v173_v13 = vsel %vm142_vm0, %v136_v10, 0.0  ;;  %v138_v14 = vmul.f32 %v122_v51, %v106_v44 }
  0x3e   :  { %235 = vadd.xlane.f32.xlu1 %v234_v16  ;;  %v243_v54 = vsel %vm142_vm0, %v203_v50, 0.0  ;;  %v2672_v16 = vld [vmem:[%s3949_s8 + $0x2c] ss:$16 sps:$4 sm:$0xff]   ;;  %v182_v17 = vsel %vm142_vm0, %v139_v11, 0.0  ;;  %v179_v12 = vsel %vm142_vm0, %v138_v14, 0.0 }
  0x3f   :  { %232 = vadd.xlane.f32.xlu0 %v231_v18  ;;  %v141_v18 = vmul.f32 %v125_v63, %v109_v58  ;;  %1259 = vmatprep.subr.bf16.mxu1 %v2672_v16  ;;  %v2687_v50 = vld [vmem:[%s3951_s10 + $0x174] ss:$8 sps:$4 sm:$0xff]  }
  0x40   :  { %2637 = vmatmul.mubr.msk.bf16.gmra.mxu1 %vm142_vm0, %v68_v46  ;;  %v204_v46 = vmul.f32 %v107_v41, %v107_v41 }
  0x41   :  { %2640 = vmatprep.mubr.msk.bf16.mxu1 %vm142_vm0, %v70_v2  ;;  %v124_v2 = vunpack.c.l.bf16 %v3058_v49  ;;  %v176_v49 = vsel %vm142_vm0, %v137_v8, 0.0  ;;  %1260 = vmatpush1.bf16.msra.mxu1 %v2670_v15 }
  0x42   :  { %315 = vadd.xlane.f32.xlu1 %v314_v20  ;;  %v246_v52 = vsel %vm142_vm0, %v204_v46, 0.0  ;;  %v188_v20 = vsel %vm142_vm0, %v141_v18, 0.0  ;;  %1261 = vmatprep.subr.bf16.mxu1 %v2675_v25 }
  0x43   :  { %312 = vadd.xlane.f32.xlu0 %v311_v23  ;;  %v285_v6 = vmul.f32 %v124_v2, %v124_v2  ;;  %v2678_v23 = vld [vmem:[%s3949_s8 + $0x20] ss:$16 sps:$4 sm:$0xff]  }
  0x44   :  { %1147 = vmatpush1.bf16.msra.mxu0 %v2678_v23 }
  0x45   :  { %v329_v9 = vsel %vm142_vm0, %v285_v6, 0.0  ;;  %1262 = vmatpush1.bf16.msra.mxu1 %v2673_v24 }
  0x46   :  { %159 = vadd.xlane.f32.xlu1 %v158_v27  ;;  %v2681_v27 = vld [vmem:[%s3949_s8] ss:$16 sps:$4 sm:$0xff]   ;;  %1965 = vmatprep.subr.bf16.mxu1 %v2687_v50 }
  0x47   :  { %156 = vadd.xlane.f32.xlu0 %v155_v30 }
  0x48   :  { %2641 = vmatmul.mubr.msk.bf16.gmra.mxu1 %vm142_vm0, %v72_v19  ;;  %v140_v19 = vmul.f32 %v124_v2, %v108_v60 }
  0x49   :  { %2644 = vmatprep.mubr.msk.bf16.mxu1 %vm142_vm0, %v74_v26  ;;  %v2679_v26 = vld [vmem:[%s3949_s8 + $0x4] ss:$16 sps:$4 sm:$0xff]  }
  0x4a   :  { %241 = vadd.xlane.f32.xlu1 %v240_v33  ;;  %v185_v21 = vsel %vm142_vm0, %v140_v19, 0.0  ;;  %1148 = vmatprep.subr.bf16.mxu0 %v2679_v26 }
  0x4b   :  { %238 = vadd.xlane.f32.xlu0 %v237_v37  ;;  %1149 = vmatpush1.bf16.msra.mxu0 %v2681_v27 }
  0x4e   :  { %321 = vadd.xlane.f32.xlu1 %v320_v39 }
  0x4f   :  { %318 = vadd.xlane.f32.xlu0 %v317_v42 }
  0x50   :  { %2645 = vmatmul.mubr.msk.bf16.gmra.mxu1 %vm142_vm0, %v76_v35 }
  0x51   :  { %1279 = vmatprep.mubr.bf16.mxu1 %v2857_v28 }
  0x52   :  { %165 = vadd.xlane.f32.xlu1 %v164_v45 }
  0x53   :  { %162 = vadd.xlane.f32.xlu0 %v161_v48  ;;  %v2684_v48 = vld [vmem:[%s3951_s10 + $0x74] ss:$8 sps:$4 sm:$0xff]  }
  0x54   :  { %1852 = vmatprep.subr.bf16.mxu0 %v2684_v48 }
  0x56   :  { %247 = vadd.xlane.f32.xlu1 %v246_v52 }
  0x57   :  { %244 = vadd.xlane.f32.xlu0 %v243_v54 }
  0x5a   :  { %327 = vadd.xlane.f32.xlu1 %v326_v56 }
  0x5b   :  { %324 = vadd.xlane.f32.xlu0 %v323_v59 }
  0x5e   :  { %171 = vadd.xlane.f32.xlu1 %v170_v61 }
  0x5f   :  { %168 = vadd.xlane.f32.xlu0 %v167_v0 }
  0x62   :  { %253 = vadd.xlane.f32.xlu1 %v252_v3 }
  0x63   :  { %250 = vadd.xlane.f32.xlu0 %v249_v5 }
  0x66   :  { %333 = vadd.xlane.f32.xlu1 %v332_v7 }
  0x67   :  { %330 = vadd.xlane.f32.xlu0 %v329_v9 }
  0x6a   :  { %177 = vadd.xlane.f32.xlu1 %v176_v49 }
  0x6b   :  { %174 = vadd.xlane.f32.xlu0 %v173_v13 }
  0x6e   :  { %183 = vadd.xlane.f32.xlu1 %v182_v17 }
  0x6f   :  { %180 = vadd.xlane.f32.xlu0 %v179_v12 }
  0x72   :  { %189 = vadd.xlane.f32.xlu1 %v188_v20 }
  0x73   :  { %186 = vadd.xlane.f32.xlu0 %v185_v21  ;;  %v400_v21 = vlaneseq }
  0x9f   :  { %v289_v29 = vpop.xlane.xlu1 %288 }
  0xa0   :  { %v209_v30 = vpop.xlane.xlu0 %208  ;;  %v335_v61 = vmax.f32 %v289_v29, 1e-16 }
  0xa1   :  { %v255_v60 = vmax.f32 %v209_v30, 1e-16  ;;  %v3302_v30 = vshrl.u32 %v400_v21, 7 }
  0xa3   :  { %v292_v31 = vpop.xlane.xlu1 %291  ;;  %v351_v1 = vmul.f32 %v335_v61, %v255_v60  ;;  %vm450_vm1 = vcmp.lt.s32.totalorder %v3302_v30, 6  ;;  %vm500_vm2 = vcmp.ge.s32.totalorder %v3302_v30, 6 }
  0xa4   :  { %v212_v32 = vpop.xlane.xlu0 %211  ;;  %v336_v3 = vmax.f32 %v292_v31, 1e-16 }
  0xa5   :  { %v256_v2 = vmax.f32 %v212_v32, 1e-16  ;;  %2810 = vrsqrt.f32 %v351_v1 }
  0xa7   :  { %v218_v33 = vpop.xlane.xlu1 %217  ;;  %v352_v10 = vmul.f32 %v336_v3, %v256_v2 }
  0xa8   :  { %v215_v34 = vpop.xlane.xlu0 %214  ;;  %v258_v5 = vmax.f32 %v218_v33, 1e-16 }
  0xa9   :  { %v257_v49 = vmax.f32 %v215_v34, 1e-16  ;;  %2812 = vrsqrt.f32 %v352_v10 }
  0xab   :  { %v298_v35 = vpop.xlane.xlu1 %297 }
  0xac   :  { %v295_v37 = vpop.xlane.xlu0 %294  ;;  %v338_v6 = vmax.f32 %v298_v35, 1e-16 }
  0xad   :  { %v337_v11 = vmax.f32 %v295_v37, 1e-16 }
  0xae   :  { %v354_v14 = vmul.f32 %v338_v6, %v258_v5  ;;  %v3327_v6 = vstv %s3942_s1 }
  0xaf   :  { %v3221_v38 = vpop.xlane.xlu1 %223  ;;  %v353_v18 = vmul.f32 %v337_v11, %v257_v49 }
  0xb0   :  { %v3223_v39 = vpop.xlane.xlu0 %220  ;;  %2814 = vrsqrt.f32 %v354_v14  ;;  %v260_v19 = vmax.f32 %v3221_v38, 1e-16 }
  0xb1   :  { %v259_v23 = vmax.f32 %v3223_v39, 1e-16  ;;  %2816 = vrsqrt.f32 %v353_v18 }
  0xb2   :  { %v2811_v39 = vpop.eup %2810 }
  0xb3   :  { %v304_v36 = vpop.xlane.xlu1 %303 }
  0xb4   :  { %v3225_v41 = vpop.xlane.xlu0 %300  ;;  %v340_v20 = vmax.f32 %v304_v36, 1e-16  ;;  %v483_v36 = vstv %s482_s18 }
  0xb5   :  { %v339_v24 = vmax.f32 %v3225_v41, 1e-16  ;;  %v484_v61 = vsel %vm450_vm1, %v483_v36, 0.0 }
  0xb6   :  { %v356_v29 = vmul.f32 %v340_v20, %v260_v19  ;;  %v2813_v5 = vpop.eup %2812 }
  0xb7   :  { %v3227_v42 = vpop.xlane.xlu1 %147  ;;  %v355_v32 = vmul.f32 %v339_v24, %v259_v23 }
  0xb8   :  { %v3229_v43 = vpop.xlane.xlu0 %144  ;;  %2818 = vrsqrt.f32 %v356_v29  ;;  %v384_v23 = vmul.f32 %v2813_v5, %v3227_v42 }
  0xb9   :  { %2820 = vrsqrt.f32 %v355_v32  ;;  %v383_v1 = vmul.f32 %v2811_v39, %v3229_v43 }
  0xbb   :  { %v3231_v44 = vpop.xlane.xlu1 %229  ;;  %v568_v21 = vsub.f32 %v383_v1, %v3327_v6  ;;  %v569_v1 = vsub.f32 %v384_v23, %v3327_v6 }
  0xbc   :  { %v3233_v45 = vpop.xlane.xlu0 %226  ;;  %v262_v35 = vmax.f32 %v3231_v44, 1e-16 }
  0xbd   :  { %v261_v50 = vmax.f32 %v3233_v45, 1e-16  ;;  %v2815_v11 = vpop.eup %2814  ;;  %v402_v45 = vadd.s32 8, %v3302_v30 }
  0xbe   :  { %v2817_v32 = vpop.eup %2816 }
  0xbf   :  { %v3235_v46 = vpop.xlane.xlu1 %309  ;;  %vm517_vm3 = vcmp.lt.s32.totalorder %v402_v45, 9 }
  0xc0   :  { %v3237_v47 = vpop.xlane.xlu0 %306  ;;  %v342_v37 = vmax.f32 %v3235_v46, 1e-16  ;;  %v549_v46 = vstv %s3298_s19 }
  0xc1   :  { %v341_v60 = vmax.f32 %v3237_v47, 1e-16  ;;  %v550_v43 = vsel %vm500_vm2, %v549_v46, %v484_v61 }
  0xc2   :  { %v358_v2 = vmul.f32 %v342_v37, %v262_v35  ;;  %v584_v61 = vmul.f32 %v568_v21, %v550_v43 }
  0xc3   :  { %v3245_v51 = vpop.xlane.xlu1 %153  ;;  %v357_v19 = vmul.f32 %v341_v60, %v261_v50 }
  0xc4   :  { %v3247_v52 = vpop.xlane.xlu0 %150  ;;  %2822 = vrsqrt.f32 %v358_v2  ;;  %v386_v35 = vmul.f32 %v2815_v11, %v3245_v51 }
  0xc5   :  { %2824 = vrsqrt.f32 %v357_v19  ;;  %v385_v51 = vmul.f32 %v2817_v32, %v3247_v52  ;;  %v2819_v5 = vpop.eup %2818 }
  0xc6   :  { %v571_v2 = vsub.f32 %v386_v35, %v3327_v6  ;;  %v2821_v45 = vpop.eup %2820 }
  0xc7   :  { %v3249_v53 = vpop.xlane.xlu1 %235 }
  0xc8   :  { %v3251_v54 = vpop.xlane.xlu0 %232  ;;  %v264_v37 = vmax.f32 %v3249_v53, 1e-16 }
  0xcb   :  { %v3253_v55 = vpop.xlane.xlu1 %315 }
  0xcc   :  { %v3255_v56 = vpop.xlane.xlu0 %312  ;;  %v344_v39 = vmax.f32 %v3253_v55, 1e-16  ;;  %v551_v55 = vsel %vm517_vm3, %v549_v46, 0.0 }
  0xcd   :  { %v343_v50 = vmax.f32 %v3255_v56, 1e-16  ;;  %v3355_v56 = vld [vmem:[%s3947_s6] ss:$0 sm:$0xff]  ;;  %v585_v46 = vmul.f32 %v569_v1, %v551_v55 }
  0xce   :  { %v961_v19 = vmul.f32 %v3355_v56, %v584_v61 }
  0xcf   :  { %v3257_v57 = vpop.xlane.xlu1 %159 }
  0xd0   :  { %v3259_v58 = vpop.xlane.xlu0 %156  ;;  %v388_v21 = vmul.f32 %v2819_v5, %v3257_v57 }
  0xd1   :  { %v387_v32 = vmul.f32 %v2821_v45, %v3259_v58  ;;  %v2823_v57 = vpop.eup %2822  ;;  %v962_v58 = vmul.f32 %v3355_v56, %v585_v46 }
  0xd2   :  { %v2825_v5 = vpop.eup %2824 }
  0xd3   :  { %v3261_v59 = vpop.xlane.xlu1 %241 }
  0xd4   :  { %v3263_v40 = vpop.xlane.xlu0 %238  ;;  %v266_v52 = vmax.f32 %v3261_v59, 1e-16 }
  0xd5   :  { %v265_v59 = vmax.f32 %v3263_v40, 1e-16  ;;  %v572_v40 = vsub.f32 %v387_v32, %v3327_v6 }
  0xd7   :  { %v3265_v62 = vpop.xlane.xlu1 %321 }
  0xd8   :  { %v3267_v63 = vpop.f32.mrf.mxu1  ;;  %v3269_v0 = vpop.xlane.xlu0 %318 }
  0xda   :  { %v3271_v4 = vpop.f32.mrf.mxu1 }
  0xdb   :  { %v3273_v7 = vpop.xlane.xlu1 %165 }
  0xdc   :  { %v3275_v8 = vpop.f32.mrf.mxu1  ;;  %v3277_v9 = vpop.xlane.xlu0 %162 }
  0xde   :  { %v3279_v13 = vpop.f32.mrf.mxu1 }
  0xdf   :  { %v3281_v15 = vpop.xlane.xlu1 %247 }
  0xe0   :  { %v3283_v16 = vpop.f32.mrf.mxu1  ;;  %v3285_v17 = vpop.xlane.xlu0 %244  ;;  %v268_v45 = vmax.f32 %v3281_v15, 1e-16  ;;  %v389_v15 = vmul.f32 %v2825_v5, %v3277_v9  ;;  %v2682_v9 = vld [vmem:[%s3951_s10 + $0x70] ss:$8 sps:$4 sm:$0xff]  }
  0xe2   :  { %v3287_v12 = vpop.f32.mrf.mxu1 }
  0xe3   :  { %v3290_v22 = vpop.xlane.xlu1 %327 }
  0xe4   :  { %v3294_v25 = vpop.f32.mrf.mxu1  ;;  %v3296_v26 = vpop.xlane.xlu0 %324 }
  0xe6   :  { %v3300_v27 = vpop.f32.mrf.mxu1 }
  0xe7   :  { %v3304_v31 = vpop.xlane.xlu1 %171 }
  0xe8   :  { %v3306_v33 = vpop.f32.mrf.mxu1  ;;  %v3308_v34 = vpop.xlane.xlu0 %168 }
  0xea   :  { %v3312_v38 = vpop.f32.mrf.mxu1 }
  0xeb   :  { %v254_v41 = vpop.xlane.xlu1 %253 }
  0xec   :  { %v3315_v48 = vpop.f32.mrf.mxu1  ;;  %v251_v44 = vpop.xlane.xlu0 %250  ;;  %v270_v10 = vmax.f32 %v254_v41, 1e-16  ;;  %v263_v41 = vmax.f32 %v3251_v54, 1e-16  ;;  %v360_v54 = vmul.f32 %v344_v39, %v264_v37 }
  0xed   :  { %v269_v14 = vmax.f32 %v251_v44, 1e-16 }
  0xee   :  { %v3322_v3 = vpop.f32.mrf.mxu1 }
  0xef   :  { %v334_v49 = vpop.xlane.xlu1 %333 }
  0xf0   :  { %v3330_v47 = vpop.f32.mrf.mxu1  ;;  %v350_v18 = vmax.f32 %v334_v49, 1e-16  ;;  %v331_v20 = vpop.xlane.xlu0 %330 }
  0xf1   :  { %v349_v29 = vmax.f32 %v331_v20, 1e-16  ;;  %v587_v20 = vmul.f32 0.0, %v571_v2 }
  0xf2   :  { %v3336_v24 = vpop.f32.mrf.mxu1  ;;  %v366_v36 = vmul.f32 %v350_v18, %v270_v10  ;;  %v359_v10 = vmul.f32 %v343_v50, %v263_v41  ;;  %v570_v18 = vsub.f32 %v385_v51, %v3327_v6 }
  0xf3   :  { %v365_v42 = vmul.f32 %v349_v29, %v269_v14  ;;  %v3357_v11 = vpop.xlane.xlu1 %177  ;;  %v346_v14 = vmax.f32 %v3265_v62, 1e-16  ;;  %v345_v62 = vmax.f32 %v3269_v0, 1e-16  ;;  %v3380_v0 = vld [vmem:[%s3948_s7] ss:$0 sm:$0xff] }
  0xf4   :  { %v3343_v60 = vpop.f32.mrf.mxu1  ;;  %v3345_v44 = vpop.xlane.xlu0 %174 }
  0xf5   :  { %2826 = vrsqrt.f32 %v365_v42  ;;  %v362_v37 = vmul.f32 %v346_v14, %v266_v52  ;;  %v586_v42 = vmul.f32 0.0, %v570_v18  ;;  %v361_v1 = vmul.f32 %v345_v62, %v265_v59 }
  0xf6   :  { %v3349_v53 = vpop.f32.mrf.mxu1  ;;  %2828 = vrsqrt.f32 %v366_v36  ;;  %v348_v52 = vmax.f32 %v3290_v22, 1e-16 }
  0xf7   :  { %2830 = vrsqrt.f32 %v360_v54  ;;  %v3371_v50 = vpop.xlane.xlu1 %183 }
  0xf8   :  { %v2634_v49 = vpop.f32.mrf.mxu1  ;;  %v3365_v29 = vpop.xlane.xlu0 %180  ;;  %2832 = vrsqrt.f32 %v359_v10  ;;  %v390_v10 = vmul.f32 %v2823_v57, %v3273_v7 }
  0xf9   :  { %2834 = vrsqrt.f32 %v362_v37  ;;  %v900_v55 = vadd.f32 %v2634_v49, %v3267_v63  ;;  %v267_v49 = vmax.f32 %v3285_v17, 1e-16 }
  0xfa   :  { %v891_v43 = vpop.f32.mrf.mxu1  ;;  %2836 = vrsqrt.f32 %v361_v1  ;;  %v575_v37 = vsub.f32 %v390_v10, %v3327_v6 }
  0xfb   :  { %v892_v23 = vadd.f32 %v891_v43, %v3271_v4  ;;  %v573_v4 = vsub.f32 %v388_v21, %v3327_v6  ;;  %v347_v21 = vmax.f32 %v3296_v26, 1e-16  ;;  %v190_v32 = vpop.xlane.xlu1 %189 }
  0xfc   :  { %v2635_v35 = vpop.f32.mrf.mxu1  ;;  %v187_v54 = vpop.xlane.xlu0 %186 }
  0xfd   :  { %v977_v39 = vadd.f32 %v961_v19, %v892_v23  ;;  %v903_v36 = vadd.f32 %v2635_v35, %v3275_v8  ;;  %v964_v8 = vmul.f32 %v3355_v56, %v587_v20  ;;  %v589_v43 = vmul.f32 0.0, %v573_v4  ;;  %v2685_v4 = vld [vmem:[%s3951_s10 + $0x170] ss:$8 sps:$4 sm:$0xff]  }
  0xfe   :  { %v894_v41 = vpop.f32.mrf.mxu1  ;;  %v963_v19 = vmul.f32 %v3355_v56, %v586_v42  ;;  %v588_v35 = vmul.f32 0.0, %v572_v40 }
  0xff   :  { %v895_v61 = vadd.f32 %v894_v41, %v3279_v13  ;;  %v1000_v2 = vadd.f32 %v3380_v0, %v977_v39  ;;  %v980_v14 = vadd.f32 %v964_v8, %v903_v36  ;;  %v364_v39 = vmul.f32 %v348_v52, %v268_v45  ;;  %v2688_v45 = vld [vmem:[%s3951_s10 + $0x60] ss:$8 sps:$4 sm:$0xff]  }
 0x100   :  { %v3383_v51 = vpop.f32.mrf.mxu1  ;;  %v979_v22 = vadd.f32 %v963_v19, %v900_v55  ;;  %v966_v1 = vmul.f32 %v3355_v56, %v589_v43  ;;  %v2693_v55 = vld [vmem:[%s3951_s10 + $0x164] ss:$8 sps:$4 sm:$0xff]   ;;  %v591_v52 = vmul.f32 0.0, %v575_v37  ;;  %v2691_v43 = vld [vmem:[%s3951_s10 + $0x160] ss:$8 sps:$4 sm:$0xff]  }
 0x101   :  { %v978_v13 = vadd.f32 %v962_v58, %v895_v61  ;;  %v1016_v59 = vmax.f32 %v1000_v2, 0.0  ;;  %v1003_v36 = vadd.f32 %v3380_v0, %v980_v14  ;;  %v363_v58 = vmul.f32 %v347_v21, %v267_v49  ;;  %v2696_v21 = vld [vmem:[%s3951_s10 + $0x54] ss:$8 sps:$4 sm:$0xff]  }
 0x102   :  { %v907_v46 = vpop.f32.mrf.mxu1  ;;  %v2827_v18 = vpop.eup %2826  ;;  %2838 = vrsqrt.f32 %v364_v39 }
 0x103   :  { %v1001_v20 = vadd.f32 %v3380_v0, %v978_v13  ;;  %v2829_v63 = vpop.eup %2828  ;;  %v397_v7 = vmul.f32 %v2827_v18, %v187_v54  ;;  %v908_v40 = vadd.f32 %v907_v46, %v3287_v12  ;;  %v574_v13 = vsub.f32 %v389_v15, %v3327_v6 }
 0x104   :  { %v2639_v23 = vpop.f32.mrf.mxu1  ;;  %v398_v42 = vmul.f32 %v2829_v63, %v190_v32  ;;  %v2831_v61 = vpop.eup %2830  ;;  %v1002_v54 = vadd.f32 %v3380_v0, %v979_v22  ;;  %v965_v12 = vmul.f32 %v3355_v56, %v588_v35  ;;  %v1019_v14 = vmax.f32 %v1003_v36, 0.0  ;;  %v2694_v36 = vld [vmem:[%s3951_s10 + $0x50] ss:$8 sps:$4 sm:$0xff]  }
 0x105   :  { %v1017_v62 = vmax.f32 %v1001_v20, 0.0  ;;  %v582_v26 = vsub.f32 %v397_v7, %v3327_v6  ;;  %v2833_v2 = vpop.eup %2832  ;;  %2840 = vrsqrt.f32 %v363_v58  ;;  %v392_v20 = vmul.f32 %v2831_v61, %v3304_v31  ;;  %v2699_v7 = vld [vmem:[%s3951_s10 + $0x154] ss:$8 sps:$4 sm:$0xff]  }
 0x106   :  { %v910_v41 = vpop.f32.mrf.mxu1  ;;  %v583_v18 = vsub.f32 %v398_v42, %v3327_v6  ;;  %v391_v19 = vmul.f32 %v2833_v2, %v3308_v34  ;;  %v981_v63 = vadd.f32 %v965_v12, %v908_v40  ;;  %v590_v32 = vmul.f32 0.0, %v574_v13  ;;  %v2835_v22 = vpop.eup %2834  ;;  %v2705_v42 = vld [vmem:[%s3951_s10 + $0x144] ss:$8 sps:$4 sm:$0xff]  }
 0x107   :  { %v1032_v57 = vpack.c.bf16 %v1017_v62, %v1016_v59  ;;  %v911_v17 = vadd.f32 %v910_v41, %v3300_v27  ;;  %v2690_v27 = vld [vmem:[%s3951_s10 + $0x64] ss:$8 sps:$4 sm:$0xff]   ;;  %v598_v46 = vmul.f32 0.0, %v582_v26  ;;  %v1018_v15 = vmax.f32 %v1002_v54, 0.0  ;;  %v2697_v41 = vld [vmem:[%s3951_s10 + $0x150] ss:$8 sps:$4 sm:$0xff]  }
 0x108   :  { %v3407_v8 = vpop.f32.mrf.mxu1  ;;  %v919_v34 = vadd.f32 %v2639_v23, %v3294_v25  ;;  %v968_v35 = vmul.f32 %v3355_v56, %v591_v52  ;;  %v599_v37 = vmul.f32 0.0, %v583_v18  ;;  %v576_v25 = vsub.f32 %v391_v19, %v3327_v6  ;;  %v2702_v26 = vld [vmem:[%s3951_s10 + $0x44] ss:$8 sps:$4 sm:$0xff]   ;;  %v2711_v52 = vld [vmem:[%s3951_s10 + $0x134] ss:$8 sps:$4 sm:$0xff]  }
 0x109   :  { %2427 = vmatmul.mubr.msk.bf16.vlgmr.msra.gmra.mxu0 %vm142_vm0, %v1032_v57  ;;  %2435 = vmatmul.mubr.msk.bf16.vlgmr.msra.gmra.mxu1 %vm142_vm0, %v1032_v57  ;;  %v982_v5 = vadd.f32 %v966_v1, %v911_v17  ;;  %v1033_v62 = vpack.c.bf16 %v1019_v14, %v1018_v15  ;;  %v975_v39 = vmul.f32 %v3355_v56, %v598_v46 }
 0x10a   :  { %v3420_v10 = vpop.f32.mrf.mxu1  ;;  %1176 = vmatprep.mubr.bf16.mxu0 %v2857_v28  ;;  %1289 = vmatprep.mubr.bf16.mxu1 %v2857_v28  ;;  %v577_v23 = vsub.f32 %v392_v20, %v3327_v6  ;;  %v1004_v57 = vadd.f32 %v3380_v0, %v981_v63  ;;  %v967_v61 = vmul.f32 %v3355_v56, %v590_v32  ;;  %v592_v13 = vmul.f32 0.0, %v576_v25 }
 0x10b   :  { %1853 = vmatpush1.bf16.msra.mxu0 %v2682_v9  ;;  %1966 = vmatpush1.bf16.msra.mxu1 %v2685_v4  ;;  %v1005_v31 = vadd.f32 %v3380_v0, %v982_v5  ;;  %v2837_v9 = vpop.eup %2836  ;;  %v916_v4 = vadd.f32 %v3383_v51, %v3283_v16  ;;  %v984_v40 = vadd.f32 %v968_v35, %v919_v34  ;;  %v2708_v51 = vld [vmem:[%s3951_s10 + $0x34] ss:$8 sps:$4 sm:$0xff]   ;;  %v2717_v34 = vld [vmem:[%s3951_s10 + $0x124] ss:$8 sps:$4 sm:$0xff]  }
 0x10c   :  { %v3433_v49 = vpop.f32.mrf.mxu1  ;;  %1854 = vmatprep.subr.bf16.mxu0 %v2690_v27  ;;  %1967 = vmatprep.subr.bf16.mxu1 %v2693_v55  ;;  %v394_v1 = vmul.f32 %v2835_v22, %v3357_v11  ;;  %v976_v16 = vmul.f32 %v3355_v56, %v599_v37  ;;  %v2703_v11 = vld [vmem:[%s3951_s10 + $0x140] ss:$8 sps:$4 sm:$0xff]   ;;  %v593_v54 = vmul.f32 0.0, %v577_v23  ;;  %v1020_v12 = vmax.f32 %v1004_v57, 0.0  ;;  %v2720_v57 = vld [vmem:[%s3951_s10 + $0x14] ss:$8 sps:$4 sm:$0xff]  }
 0x10d   :  { %v1021_v27 = vmax.f32 %v1005_v31, 0.0  ;;  %v393_v5 = vmul.f32 %v2837_v9, %v3345_v44  ;;  %v983_v14 = vadd.f32 %v967_v61, %v916_v4  ;;  %v1007_v18 = vadd.f32 %v3380_v0, %v984_v40  ;;  %v2715_v23 = vld [vmem:[%s3951_s10 + $0x120] ss:$8 sps:$4 sm:$0xff]  }
 0x10e   :  { %v926_v59 = vpop.f32.mrf.mxu1  ;;  %v969_v15 = vmul.f32 %v3355_v56, %v592_v13  ;;  %v970_v22 = vmul.f32 %v3355_v56, %v593_v54  ;;  %v935_v40 = vadd.f32 %v3433_v49, %v3315_v48  ;;  %v2726_v48 = vld [vmem:[%s3951_s10 + $0x4] ss:$8 sps:$4 sm:$0xff]  }
 0x10f   :  { %1855 = vmatpush1.bf16.msra.mxu0 %v2688_v45  ;;  %1968 = vmatpush1.bf16.msra.mxu1 %v2691_v43  ;;  %v579_v43 = vsub.f32 %v394_v1, %v3327_v6  ;;  %v1034_v19 = vpack.c.bf16 %v1021_v27, %v1020_v12  ;;  %v2839_v20 = vpop.eup %2838  ;;  %v927_v63 = vadd.f32 %v926_v59, %v3322_v3  ;;  %v2714_v3 = vld [vmem:[%s3951_s10 + $0x24] ss:$8 sps:$4 sm:$0xff]   ;;  %v2718_v27 = vld [vmem:[%s3951_s10 + $0x10] ss:$8 sps:$4 sm:$0xff]  }
 0x110   :  { %v2646_v17 = vpop.f32.mrf.mxu1  ;;  %1856 = vmatprep.subr.bf16.mxu0 %v2696_v21  ;;  %1969 = vmatprep.subr.bf16.mxu1 %v2699_v7  ;;  %v2706_v7 = vld [vmem:[%s3951_s10 + $0x30] ss:$8 sps:$4 sm:$0xff]   ;;  %v578_v32 = vsub.f32 %v393_v5, %v3327_v6  ;;  %v1006_v59 = vadd.f32 %v3380_v0, %v983_v14  ;;  %v2729_v49 = vld [vmem:[%s3951_s10 + $0x104] ss:$8 sps:$4 sm:$0xff]   ;;  %v2732_v5 = vld [vmem:[%s3951_s10 + $0xf4] ss:$8 sps:$4 sm:$0xff]  }
 0x111   :  { %v948_v58 = vadd.f32 %v2646_v17, %v3330_v47  ;;  %2428 = vmatmul.mubr.msk.bf16.gmra.mxu0 %vm142_vm0, %v1033_v62  ;;  %2436 = vmatmul.mubr.msk.bf16.gmra.mxu1 %vm142_vm0, %v1033_v62  ;;  %v2700_v47 = vld [vmem:[%s3951_s10 + $0x40] ss:$8 sps:$4 sm:$0xff]   ;;  %v924_v62 = vadd.f32 %v3420_v10, %v3312_v38  ;;  %v595_v37 = vmul.f32 0.0, %v579_v43  ;;  %v986_v25 = vadd.f32 %v970_v22, %v927_v63  ;;  %v2723_v17 = vld [vmem:[%s3951_s10 + $0x114] ss:$8 sps:$4 sm:$0xff]  }
 0x112   :  { %v3467_v55 = vpop.f32.mrf.mxu1  ;;  %1186 = vmatprep.mubr.bf16.mxu0 %v2857_v28  ;;  %1299 = vmatprep.mubr.bf16.mxu1 %v2857_v28  ;;  %v2841_v31 = vpop.eup %2840  ;;  %v2730_v63 = vld [vmem:[%s3951_s10 + $0xf0] ss:$8 sps:$4 sm:$0xff]  }
 0x113   :  { %v991_v2 = vadd.f32 %v975_v39, %v948_v58  ;;  %1857 = vmatpush1.bf16.msra.mxu0 %v2694_v36  ;;  %1970 = vmatpush1.bf16.msra.mxu1 %v2697_v41  ;;  %v396_v39 = vmul.f32 %v2839_v20, %v3371_v50  ;;  %v2712_v36 = vld [vmem:[%s3951_s10 + $0x20] ss:$8 sps:$4 sm:$0xff]   ;;  %v1023_v41 = vmax.f32 %v1007_v18, 0.0  ;;  %v395_v50 = vmul.f32 %v2841_v31, %v3365_v29 }
 0x114   :  { %v2647_v45 = vpop.f32.mrf.mxu1  ;;  %1858 = vmatprep.subr.bf16.mxu0 %v2702_v26  ;;  %1971 = vmatprep.subr.bf16.mxu1 %v2705_v42  ;;  %v1022_v26 = vmax.f32 %v1006_v59, 0.0  ;;  %v594_v42 = vmul.f32 0.0, %v578_v32  ;;  %v985_v9 = vadd.f32 %v969_v15, %v924_v62  ;;  %v972_v58 = vmul.f32 %v3355_v56, %v595_v37  ;;  %v2745_v37 = vld [vmem:[%s3951_s10 + $0x1d0] ss:$8 sps:$4 sm:$0xff]  }
 0x115   :  { %v951_v46 = vadd.f32 %v2647_v45, %v3343_v60  ;;  %v1014_v44 = vadd.f32 %v3380_v0, %v991_v2  ;;  %v2709_v60 = vld [vmem:[%s3951_s10 + $0x130] ss:$8 sps:$4 sm:$0xff]   ;;  %v581_v61 = vsub.f32 %v396_v39, %v3327_v6  ;;  %v1009_v1 = vadd.f32 %v3380_v0, %v986_v25  ;;  %v2735_v45 = vld [vmem:[%s3951_s10 + $0x1f4] ss:$8 sps:$4 sm:$0xff]   ;;  %v2750_v39 = vld [vmem:[%s3951_s10 + $0xc4] ss:$8 sps:$4 sm:$0xff]  }
 0x116   :  { %v1035_v29 = vpack.c.bf16 %v1023_v41, %v1022_v26  ;;  %v2721_v2 = vld [vmem:[%s3951_s10 + $0x110] ss:$8 sps:$4 sm:$0xff]   ;;  %v988_v13 = vadd.f32 %v972_v58, %v935_v40  ;;  %v942_v12 = vpop.f32.mrf.mxu1  ;;  %v2771_v58 = vld [vmem:[%s3951_s10 + $0x194] ss:$8 sps:$4 sm:$0xff]  }
 0x117   :  { %v992_v21 = vadd.f32 %v976_v16, %v951_v46  ;;  %1859 = vmatpush1.bf16.msra.mxu0 %v2700_v47  ;;  %1972 = vmatpush1.bf16.msra.mxu1 %v2703_v11  ;;  %v1030_v38 = vmax.f32 %v1014_v44, 0.0  ;;  %v580_v16 = vsub.f32 %v395_v50, %v3327_v6  ;;  %v932_v47 = vadd.f32 %v3407_v8, %v3306_v33  ;;  %v2724_v33 = vld [vmem:[%s3951_s10] ss:$8 sps:$4 sm:$0xff]   ;;  %v2733_v44 = vld [vmem:[%s3951_s10 + $0x1f0] ss:$8 sps:$4 sm:$0xff]  }
 0x118   :  { %1860 = vmatprep.subr.bf16.mxu0 %v2708_v51  ;;  %1973 = vmatprep.subr.bf16.mxu1 %v2711_v52  ;;  %v971_v11 = vmul.f32 %v3355_v56, %v594_v42  ;;  %v1008_v51 = vadd.f32 %v3380_v0, %v985_v9  ;;  %v597_v6 = vmul.f32 0.0, %v581_v61  ;;  %v1025_v54 = vmax.f32 %v1009_v1, 0.0  ;;  %v2727_v8 = vld [vmem:[%s3951_s10 + $0x100] ss:$8 sps:$4 sm:$0xff]   ;;  %v2757_v26 = vld [vmem:[%s3951_s10 + $0x1b0] ss:$8 sps:$4 sm:$0xff]  }
 0x119   :  { %v1015_v35 = vadd.f32 %v3380_v0, %v992_v21  ;;  %2429 = vmatmul.mubr.msk.bf16.gmra.mxu0 %vm142_vm0, %v1034_v19  ;;  %2437 = vmatmul.mubr.msk.bf16.gmra.mxu1 %vm142_vm0, %v1034_v19  ;;  %v596_v52 = vmul.f32 0.0, %v580_v16  ;;  %v1011_v43 = vadd.f32 %v3380_v0, %v988_v13  ;;  %v943_v20 = vadd.f32 %v942_v12, %v3349_v53  ;;  %v2738_v21 = vld [vmem:[%s3951_s10 + $0xe4] ss:$8 sps:$4 sm:$0xff]   ;;  %v2763_v61 = vld [vmem:[%s3951_s10 + $0x1a0] ss:$8 sps:$4 sm:$0xff]  }
 0x11a   :  { %1196 = vmatprep.mubr.bf16.mxu0 %v2857_v28  ;;  %1309 = vmatprep.mubr.bf16.mxu1 %v2857_v28  ;;  %v987_v14 = vadd.f32 %v971_v11, %v932_v47  ;;  %v1024_v46 = vmax.f32 %v1008_v51, 0.0  ;;  %v974_v18 = vmul.f32 %v3355_v56, %v597_v6  ;;  %v2741_v53 = vld [vmem:[%s3951_s10 + $0x1e4] ss:$8 sps:$4 sm:$0xff]   ;;  %v2769_v40 = vld [vmem:[%s3951_s10 + $0x190] ss:$8 sps:$4 sm:$0xff]   ;;  %v1064_v47 = vsub.s32 3, %v3302_v30 }
 0x11b   :  { %v1031_v10 = vmax.f32 %v1015_v35, 0.0  ;;  %1861 = vmatpush1.bf16.msra.mxu0 %v2706_v7  ;;  %1974 = vmatpush1.bf16.msra.mxu1 %v2709_v60  ;;  %v940_v60 = vadd.f32 %v3467_v55, %v3336_v24  ;;  %v973_v32 = vmul.f32 %v3355_v56, %v596_v52  ;;  %v1027_v15 = vmax.f32 %v1011_v43, 0.0  ;;  %v2739_v24 = vld [vmem:[%s3951_s10 + $0x1e0] ss:$8 sps:$4 sm:$0xff]   ;;  %v2744_v56 = vld [vmem:[%s3951_s10 + $0xd4] ss:$8 sps:$4 sm:$0xff]  }
 0x11c   :  { %1862 = vmatprep.subr.bf16.mxu0 %v2714_v3  ;;  %1975 = vmatprep.subr.bf16.mxu1 %v2717_v34  ;;  %v1036_v19 = vpack.c.bf16 %v1025_v54, %v1024_v46  ;;  %v1010_v7 = vadd.f32 %v3380_v0, %v987_v14  ;;  %v990_v22 = vadd.f32 %v974_v18, %v943_v20  ;;  %v2736_v3 = vld [vmem:[%s3951_s10 + $0xe0] ss:$8 sps:$4 sm:$0xff]   ;;  %v2747_v55 = vld [vmem:[%s3951_s10 + $0x1d4] ss:$8 sps:$4 sm:$0xff]   ;;  %v2742_v35 = vld [vmem:[%s3951_s10 + $0xd0] ss:$8 sps:$4 sm:$0xff]  }
 0x11d   :  { %v3527_v4 = vpack.c.bf16 %v1031_v10, %v1030_v38  ;;  %v989_v31 = vadd.f32 %v973_v32, %v940_v60  ;;  %v2748_v38 = vld [vmem:[%s3951_s10 + $0xc0] ss:$8 sps:$4 sm:$0xff]   ;;  %v2762_v42 = vld [vmem:[%s3951_s10 + $0xa4] ss:$8 sps:$4 sm:$0xff]   ;;  %v1052_v11 = vsub.s32 0, %v3302_v30  ;;  %v1060_v51 = vsub.s32 2, %v3302_v30 }
 0x11e   :  { %v1026_v34 = vmax.f32 %v1010_v7, 0.0  ;;  %v1013_v62 = vadd.f32 %v3380_v0, %v990_v22  ;;  %v2751_v10 = vld [vmem:[%s3951_s10 + $0x1c0] ss:$8 sps:$4 sm:$0xff]   ;;  %v2765_v9 = vld [vmem:[%s3951_s10 + $0x1a4] ss:$8 sps:$4 sm:$0xff]  }
 0x11f   :  { %1863 = vmatpush1.bf16.msra.mxu0 %v2712_v36  ;;  %1976 = vmatpush1.bf16.msra.mxu1 %v2715_v23  ;;  %v2753_v36 = vld [vmem:[%s3951_s10 + $0x1c4] ss:$8 sps:$4 sm:$0xff]   ;;  %v1012_v41 = vadd.f32 %v3380_v0, %v989_v31  ;;  %v2756_v0 = vld [vmem:[%s3951_s10 + $0xb4] ss:$8 sps:$4 sm:$0xff]   ;;  %v2775_v16 = vld [vmem:[%s3951_s10 + $0x180] ss:$8 sps:$4 sm:$0xff]  }
 0x120   :  { %1864 = vmatprep.subr.bf16.mxu0 %v2720_v57  ;;  %1977 = vmatprep.subr.bf16.mxu1 %v2723_v17  ;;  %v1037_v59 = vpack.c.bf16 %v1027_v15, %v1026_v34  ;;  %v1029_v25 = vmax.f32 %v1013_v62, 0.0  ;;  %v2759_v23 = vld [vmem:[%s3951_s10 + $0x1b4] ss:$8 sps:$4 sm:$0xff]   ;;  %v2754_v17 = vld [vmem:[%s3951_s10 + $0xb0] ss:$8 sps:$4 sm:$0xff]  }
 0x121   :  { %2430 = vmatmul.mubr.msk.bf16.gmra.mxu0 %vm142_vm0, %v1035_v29  ;;  %2438 = vmatmul.mubr.msk.bf16.gmra.mxu1 %vm142_vm0, %v1035_v29  ;;  %v1028_v50 = vmax.f32 %v1012_v41, 0.0  ;;  %v2766_v29 = vld [vmem:[%s3951_s10 + $0x90] ss:$8 sps:$4 sm:$0xff]   ;;  %v2774_v1 = vld [vmem:[%s3951_s10 + $0x84] ss:$8 sps:$4 sm:$0xff]  }
 0x122   :  { %1206 = vmatprep.mubr.bf16.mxu0 %v2857_v28  ;;  %1319 = vmatprep.mubr.bf16.mxu1 %v2857_v28  ;;  %v1048_v6 = vld [vmem:[%s3950_s9] sm:$0xf] }
 0x123   :  { %1865 = vmatpush1.bf16.msra.mxu0 %v2718_v27  ;;  %1978 = vmatpush1.bf16.msra.mxu1 %v2721_v2  ;;  %v1038_v57 = vpack.c.bf16 %v1029_v25, %v1028_v50  ;;  %v2777_v27 = vld [vmem:[%s3951_s10 + $0x184] ss:$8 sps:$4 sm:$0xff]   ;;  %v2772_v2 = vld [vmem:[%s3951_s10 + $0x80] ss:$8 sps:$4 sm:$0xff]   ;;  %v3700_v12 = vrot.slane %v1048_v6, %v1052_v11 }
 0x124   :  { %1866 = vmatprep.subr.bf16.mxu0 %v2726_v48  ;;  %1979 = vmatprep.subr.bf16.mxu1 %v2729_v49  ;;  %v2778_v48 = vld [vmem:[%s3953_s12 + $0x78] sm:$0xff]   ;;  %v1056_v49 = vsub.s32 1, %v3302_v30 }
 0x127   :  { %1867 = vmatpush1.bf16.msra.mxu0 %v2724_v33  ;;  %1980 = vmatpush1.bf16.msra.mxu1 %v2727_v8  ;;  %v3694_v33 = vrot.slane %v1048_v6, %v1056_v49  ;;  %v3696_v8 = vrot.slane %v1048_v6, %v1064_v47 }
 0x128   :  { %1868 = vmatprep.subr.bf16.mxu0 %v2732_v5  ;;  %1981 = vmatprep.subr.bf16.mxu1 %v2735_v45  ;;  %v3702_v5 = vrot.slane %v1048_v6, %v1060_v51 }
 0x129   :  { %2431 = vmatmul.mubr.msk.bf16.gmra.mxu0 %vm142_vm0, %v1036_v19  ;;  %2439 = vmatmul.mubr.msk.bf16.gmra.mxu1 %vm142_vm0, %v1036_v19 }
 0x12a   :  { %1216 = vmatprep.mubr.bf16.mxu0 %v2857_v28  ;;  %1329 = vmatprep.mubr.bf16.mxu1 %v2857_v28 }
 0x12b   :  { %1869 = vmatpush2.bf16.msra.mxu0 %v2730_v63  ;;  %1982 = vmatpush2.bf16.msra.mxu1 %v2733_v44 }
 0x12c   :  { %1870 = vmatprep.subr.bf16.mxu0 %v2738_v21  ;;  %1983 = vmatprep.subr.bf16.mxu1 %v2741_v53 }
 0x12f   :  { %1871 = vmatpush2.bf16.msra.mxu0 %v2736_v3  ;;  %1984 = vmatpush2.bf16.msra.mxu1 %v2739_v24 }
 0x130   :  { %1872 = vmatprep.subr.bf16.mxu0 %v2744_v56  ;;  %1985 = vmatprep.subr.bf16.mxu1 %v2747_v55 }
 0x131   :  { %2432 = vmatmul.mubr.msk.bf16.gmra.mxu0 %vm142_vm0, %v1037_v59  ;;  %2440 = vmatmul.mubr.msk.bf16.gmra.mxu1 %vm142_vm0, %v1037_v59 }
 0x132   :  { %1226 = vmatprep.mubr.bf16.mxu0 %v2857_v28  ;;  %1339 = vmatprep.mubr.bf16.mxu1 %v2857_v28 }
 0x133   :  { %1873 = vmatpush2.bf16.msra.mxu0 %v2742_v35  ;;  %1986 = vmatpush2.bf16.msra.mxu1 %v2745_v37 }
 0x134   :  { %1874 = vmatprep.subr.bf16.mxu0 %v2750_v39  ;;  %1987 = vmatprep.subr.bf16.mxu1 %v2753_v36  ;;  %v2779_v36 = vld [vmem:[%s3953_s12 + $0x38] sm:$0xff]  }
 0x137   :  { %1875 = vmatpush2.bf16.msra.mxu0 %v2748_v38  ;;  %1988 = vmatpush2.bf16.msra.mxu1 %v2751_v10 }
 0x138   :  { %1876 = vmatprep.subr.bf16.mxu0 %v2756_v0  ;;  %1989 = vmatprep.subr.bf16.mxu1 %v2759_v23  ;;  %v2780_v23 = vld [vmem:[%s3953_s12 + $0x70] sm:$0xff]  }
 0x139   :  { %2433 = vmatmul.mubr.msk.bf16.gmra.mxu0 %vm142_vm0, %v1038_v57  ;;  %2441 = vmatmul.mubr.msk.bf16.gmra.mxu1 %vm142_vm0, %v1038_v57 }
 0x13a   :  { %1236 = vmatprep.mubr.bf16.mxu0 %v2857_v28  ;;  %1349 = vmatprep.mubr.bf16.mxu1 %v2857_v28  ;;  %v2760_v28 = vld [vmem:[%s3951_s10 + $0xa0] ss:$8 sps:$4 sm:$0xff]  }
 0x13b   :  { %1877 = vmatpush2.bf16.msra.mxu0 %v2754_v17  ;;  %1990 = vmatpush2.bf16.msra.mxu1 %v2757_v26 }
 0x13c   :  { %1878 = vmatprep.subr.bf16.mxu0 %v2762_v42  ;;  %1991 = vmatprep.subr.bf16.mxu1 %v2765_v9 }
 0x13f   :  { %1879 = vmatpush2.bf16.msra.mxu0 %v2760_v28  ;;  %1992 = vmatpush2.bf16.msra.mxu1 %v2763_v61 }
 0x140   :  { %1993 = vmatprep.subr.bf16.mxu1 %v2771_v58  ;;  %v2781_v58 = vld [vmem:[%s3953_s12 + $0x30] sm:$0xff]  }
 0x141   :  { %2434 = vmatmul.mubr.msk.bf16.gmra.mxu0 %vm142_vm0, %v3527_v4  ;;  %2442 = vmatmul.mubr.msk.bf16.gmra.mxu1 %vm142_vm0, %v3527_v4  ;;  %v2768_v4 = vld [vmem:[%s3951_s10 + $0x94] ss:$8 sps:$4 sm:$0xff]  }
 0x142   :  { %1880 = vmatprep.subr.bf16.mxu0 %v2768_v4 }
 0x143   :  { %1881 = vmatpush2.bf16.msra.mxu0 %v2766_v29  ;;  %1994 = vmatpush2.bf16.msra.mxu1 %v2769_v40 }
 0x144   :  { %1882 = vmatprep.subr.bf16.mxu0 %v2774_v1  ;;  %1995 = vmatprep.subr.bf16.mxu1 %v2777_v27 }
 0x147   :  { %1883 = vmatpush2.bf16.msra.mxu0 %v2772_v2  ;;  %1996 = vmatpush2.bf16.msra.mxu1 %v2775_v16  ;;  %v2782_v2 = vld [vmem:[%s3953_s12 + $0x68] sm:$0xff]  }
 0x148   :  { %2544 = vmatprep.subr.bf16.mxu0 %v2778_v48 }
 0x1c9   :  { %v1168_v13 = vpop.f32.mrf.mxu0  ;;  %v1281_v54 = vpop.f32.mrf.mxu1 }
 0x1ca   :  { %v1169_v63 = vadd.f32 %v1168_v13, %v3700_v12  ;;  %v1282_v44 = vadd.f32 %v1281_v54, %v3702_v5 }
 0x1cb   :  { %v1170_v45 = vpop.f32.mrf.mxu0  ;;  %v1283_v52 = vpop.f32.mrf.mxu1 }
 0x1cc   :  { %v1171_v18 = vadd.f32 %v1170_v45, %v3694_v33  ;;  %v1284_v43 = vadd.f32 %v1283_v52, %v3696_v8  ;;  %v1360_v31 = vmax.f32 %v1169_v63, 0.0  ;;  %v1362_v59 = vmax.f32 %v1282_v44, 0.0  ;;  %v2784_v44 = vld [vmem:[%s3953_s12 + $0x60] sm:$0xff]  }
 0x1cd   :  { %v1172_v14 = vpop.f32.mrf.mxu0  ;;  %v1285_v46 = vpop.f32.mrf.mxu1 }
 0x1ce   :  { %v1173_v19 = vadd.f32 %v1172_v14, %v3700_v12  ;;  %v1286_v20 = vadd.f32 %v1285_v46, %v3702_v5  ;;  %v1361_v24 = vmax.f32 %v1171_v18, 0.0  ;;  %v1363_v56 = vmax.f32 %v1284_v43, 0.0  ;;  %v2783_v46 = vld [vmem:[%s3953_s12 + $0x28] sm:$0xff]  }
 0x1cf   :  { %v1174_v21 = vpop.f32.mrf.mxu0  ;;  %v1287_v53 = vpop.f32.mrf.mxu1 }
 0x1d0   :  { %v1175_v7 = vadd.f32 %v1174_v21, %v3694_v33  ;;  %v1288_v60 = vadd.f32 %v1287_v53, %v3696_v8  ;;  %v1364_v32 = vmax.f32 %v1173_v19, 0.0  ;;  %v1366_v15 = vmax.f32 %v1286_v20, 0.0 }
 0x1d1   :  { %v1178_v22 = vpop.f32.mrf.mxu0  ;;  %v1291_v3 = vpop.f32.mrf.mxu1 }
 0x1d2   :  { %v1365_v55 = vmax.f32 %v1175_v7, 0.0  ;;  %v1367_v34 = vmax.f32 %v1288_v60, 0.0  ;;  %v1424_v41 = vpack.c.bf16 %v1364_v32, %v1360_v31  ;;  %v1426_v25 = vpack.c.bf16 %v1366_v15, %v1362_v59 }
 0x1d3   :  { %v1180_v62 = vpop.f32.mrf.mxu0  ;;  %v1293_v35 = vpop.f32.mrf.mxu1  ;;  %v1179_v26 = vadd.f32 %v1178_v22, %v3700_v12  ;;  %v1292_v42 = vadd.f32 %v1291_v3, %v3702_v5 }
 0x1d4   :  { %v1425_v37 = vpack.c.bf16 %v1365_v55, %v1361_v24  ;;  %v1427_v39 = vpack.c.bf16 %v1367_v34, %v1363_v56  ;;  %v1181_v38 = vadd.f32 %v1180_v62, %v3694_v33  ;;  %v1294_v50 = vadd.f32 %v1293_v35, %v3696_v8  ;;  %v2785_v56 = vld [vmem:[%s3953_s12 + $0x20] sm:$0xff]   ;;  %v2786_v62 = vld [vmem:[%s3953_s12 + $0x58] sm:$0xff]  }
 0x1d5   :  { %v1182_v10 = vpop.f32.mrf.mxu0  ;;  %v1295_v0 = vpop.f32.mrf.mxu1  ;;  %v1368_v6 = vmax.f32 %v1179_v26, 0.0  ;;  %v1370_v13 = vmax.f32 %v1292_v42, 0.0 }
 0x1d6   :  { %v1183_v57 = vadd.f32 %v1182_v10, %v3700_v12  ;;  %v1296_v17 = vadd.f32 %v1295_v0, %v3702_v5  ;;  %1884 = vmatprep.mubr.bf16.mxu0 %v1425_v37  ;;  %1997 = vmatprep.mubr.bf16.mxu1 %v1427_v39  ;;  %v1369_v16 = vmax.f32 %v1181_v38, 0.0  ;;  %v1371_v48 = vmax.f32 %v1294_v50, 0.0  ;;  %v2787_v50 = vld [vmem:[%s3953_s12 + $0x18] sm:$0xff]  }
 0x1d7   :  { %v1184_v9 = vpop.f32.mrf.mxu0  ;;  %v1297_v28 = vpop.f32.mrf.mxu1  ;;  %1885 = vmatmul.mubr.bf16.vlgmr.msra.gmra.mxu0 %v1424_v41  ;;  %1998 = vmatmul.mubr.bf16.vlgmr.msra.gmra.mxu1 %v1426_v25 }
 0x1d8   :  { %v1185_v61 = vadd.f32 %v1184_v9, %v3694_v33  ;;  %v1298_v4 = vadd.f32 %v1297_v28, %v3696_v8  ;;  %2545 = vmatpush3.bf16.msra.mxu0 %v2779_v36  ;;  %v1372_v29 = vmax.f32 %v1183_v57, 0.0  ;;  %v1374_v40 = vmax.f32 %v1296_v17, 0.0  ;;  %v2788_v28 = vld [vmem:[%s3953_s12 + $0x50] sm:$0xff]  }
 0x1d9   :  { %v1188_v1 = vpop.f32.mrf.mxu0  ;;  %v1301_v27 = vpop.f32.mrf.mxu1  ;;  %2546 = vmatprep.subr.bf16.mxu0 %v2780_v23 }
 0x1da   :  { %v1373_v47 = vmax.f32 %v1185_v61, 0.0  ;;  %v1375_v51 = vmax.f32 %v1298_v4, 0.0  ;;  %v1428_v18 = vpack.c.bf16 %v1372_v29, %v1368_v6  ;;  %v1430_v43 = vpack.c.bf16 %v1374_v40, %v1370_v13 }
 0x1db   :  { %v1190_v54 = vpop.f32.mrf.mxu0  ;;  %v1303_v45 = vpop.f32.mrf.mxu1  ;;  %v1189_v60 = vadd.f32 %v1188_v1, %v3700_v12  ;;  %v1302_v32 = vadd.f32 %v1301_v27, %v3702_v5 }
 0x1dc   :  { %v1429_v52 = vpack.c.bf16 %v1373_v47, %v1369_v16  ;;  %v1431_v14 = vpack.c.bf16 %v1375_v51, %v1371_v48  ;;  %2547 = vmatpush3.bf16.msra.mxu0 %v2781_v58  ;;  %v1191_v19 = vadd.f32 %v1190_v54, %v3694_v33  ;;  %v1304_v21 = vadd.f32 %v1303_v45, %v3696_v8  ;;  %v2789_v48 = vld [vmem:[%s3953_s12 + $0x10] sm:$0xff]  }
 0x1dd   :  { %v1192_v20 = vpop.f32.mrf.mxu0  ;;  %v1305_v63 = vpop.f32.mrf.mxu1  ;;  %2548 = vmatprep.subr.bf16.mxu0 %v2782_v2  ;;  %v1376_v41 = vmax.f32 %v1189_v60, 0.0  ;;  %v1378_v25 = vmax.f32 %v1302_v32, 0.0 }
 0x1de   :  { %v1193_v53 = vadd.f32 %v1192_v20, %v3700_v12  ;;  %v1306_v7 = vadd.f32 %v1305_v63, %v3702_v5  ;;  %1894 = vmatprep.mubr.bf16.mxu0 %v1429_v52  ;;  %2007 = vmatprep.mubr.bf16.mxu1 %v1431_v14  ;;  %v1377_v35 = vmax.f32 %v1191_v19, 0.0  ;;  %v1379_v37 = vmax.f32 %v1304_v21, 0.0 }
 0x1df   :  { %v1194_v15 = vpop.f32.mrf.mxu0  ;;  %v1307_v22 = vpop.f32.mrf.mxu1  ;;  %1895 = vmatmul.mubr.bf16.gmra.mxu0 %v1428_v18  ;;  %2008 = vmatmul.mubr.bf16.gmra.mxu1 %v1430_v43 }
 0x1e0   :  { %v1195_v3 = vadd.f32 %v1194_v15, %v3694_v33  ;;  %v1308_v24 = vadd.f32 %v1307_v22, %v3696_v8  ;;  %2549 = vmatpush3.bf16.msra.mxu0 %v2783_v46  ;;  %v1380_v55 = vmax.f32 %v1193_v53, 0.0  ;;  %v1382_v34 = vmax.f32 %v1306_v7, 0.0 }
 0x1e1   :  { %v1198_v31 = vpop.f32.mrf.mxu0  ;;  %v1311_v59 = vpop.f32.mrf.mxu1  ;;  %2550 = vmatprep.subr.bf16.mxu0 %v2784_v44 }
 0x1e2   :  { %v1381_v39 = vmax.f32 %v1195_v3, 0.0  ;;  %v1383_v36 = vmax.f32 %v1308_v24, 0.0  ;;  %v1432_v57 = vpack.c.bf16 %v1380_v55, %v1376_v41  ;;  %v1434_v17 = vpack.c.bf16 %v1382_v34, %v1378_v25 }
 0x1e3   :  { %v1200_v38 = vpop.f32.mrf.mxu0  ;;  %v1313_v10 = vpop.f32.mrf.mxu1  ;;  %v1199_v29 = vadd.f32 %v1198_v31, %v3700_v12  ;;  %v1312_v40 = vadd.f32 %v1311_v59, %v3702_v5 }
 0x1e4   :  { %v1433_v0 = vpack.c.bf16 %v1381_v39, %v1377_v35  ;;  %v1435_v23 = vpack.c.bf16 %v1383_v36, %v1379_v37  ;;  %2551 = vmatpush3.bf16.msra.mxu0 %v2785_v56  ;;  %v1201_v26 = vadd.f32 %v1200_v38, %v3694_v33  ;;  %v1314_v61 = vadd.f32 %v1313_v10, %v3696_v8 }
 0x1e5   :  { %v1202_v42 = vpop.f32.mrf.mxu0  ;;  %v1315_v9 = vpop.f32.mrf.mxu1  ;;  %2552 = vmatprep.subr.bf16.mxu0 %v2786_v62  ;;  %v1384_v46 = vmax.f32 %v1199_v29, 0.0  ;;  %v1386_v18 = vmax.f32 %v1312_v40, 0.0 }
 0x1e6   :  { %v1203_v4 = vadd.f32 %v1202_v42, %v3700_v12  ;;  %v1316_v58 = vadd.f32 %v1315_v9, %v3702_v5  ;;  %1904 = vmatprep.mubr.bf16.mxu0 %v1433_v0  ;;  %2017 = vmatprep.mubr.bf16.mxu1 %v1435_v23  ;;  %v1385_v54 = vmax.f32 %v1201_v26, 0.0  ;;  %v1387_v45 = vmax.f32 %v1314_v61, 0.0 }
 0x1e7   :  { %v1204_v1 = vpop.f32.mrf.mxu0  ;;  %v1317_v27 = vpop.f32.mrf.mxu1  ;;  %1905 = vmatmul.mubr.bf16.gmra.mxu0 %v1432_v57  ;;  %2018 = vmatmul.mubr.bf16.gmra.mxu1 %v1434_v17 }
 0x1e8   :  { %v1205_v2 = vadd.f32 %v1204_v1, %v3694_v33  ;;  %v1318_v16 = vadd.f32 %v1317_v27, %v3696_v8  ;;  %2553 = vmatpush3.bf16.msra.mxu0 %v2787_v50  ;;  %v1388_v47 = vmax.f32 %v1203_v4, 0.0  ;;  %v1390_v51 = vmax.f32 %v1316_v58, 0.0 }
 0x1e9   :  { %v1208_v6 = vpop.f32.mrf.mxu0  ;;  %v1321_v13 = vpop.f32.mrf.mxu1  ;;  %2554 = vmatprep.subr.bf16.mxu0 %v2788_v28 }
 0x1ea   :  { %v1389_v52 = vmax.f32 %v1205_v2, 0.0  ;;  %v1391_v14 = vmax.f32 %v1318_v16, 0.0  ;;  %v1436_v44 = vpack.c.bf16 %v1388_v47, %v1384_v46  ;;  %v1438_v21 = vpack.c.bf16 %v1390_v51, %v1386_v18 }
 0x1eb   :  { %v1210_v43 = vpop.f32.mrf.mxu0  ;;  %v1323_v19 = vpop.f32.mrf.mxu1  ;;  %v1209_v3 = vadd.f32 %v1208_v6, %v3700_v12  ;;  %v1322_v24 = vadd.f32 %v1321_v13, %v3702_v5 }
 0x1ec   :  { %v1437_v20 = vpack.c.bf16 %v1389_v52, %v1385_v54  ;;  %v1439_v63 = vpack.c.bf16 %v1391_v14, %v1387_v45  ;;  %2555 = vmatpush3.bf16.msra.mxu0 %v2789_v48  ;;  %v1211_v53 = vadd.f32 %v1210_v43, %v3694_v33  ;;  %v1324_v32 = vadd.f32 %v1323_v19, %v3696_v8 }
 0x1ed   :  { %v1212_v7 = vpop.f32.mrf.mxu0  ;;  %v1325_v60 = vpop.f32.mrf.mxu1  ;;  %v1392_v38 = vmax.f32 %v1209_v3, 0.0  ;;  %v1394_v10 = vmax.f32 %v1322_v24, 0.0 }
 0x1ee   :  { %v1213_v15 = vadd.f32 %v1212_v7, %v3700_v12  ;;  %v1326_v22 = vadd.f32 %v1325_v60, %v3702_v5  ;;  %1914 = vmatprep.mubr.bf16.mxu0 %v1437_v20  ;;  %2027 = vmatprep.mubr.bf16.mxu1 %v1439_v63  ;;  %v1393_v39 = vmax.f32 %v1211_v53, 0.0  ;;  %v1395_v36 = vmax.f32 %v1324_v32, 0.0 }
 0x1ef   :  { %v1214_v56 = vpop.f32.mrf.mxu0  ;;  %v1327_v55 = vpop.f32.mrf.mxu1  ;;  %1915 = vmatmul.mubr.bf16.gmra.mxu0 %v1436_v44  ;;  %2028 = vmatmul.mubr.bf16.gmra.mxu1 %v1438_v21 }
 0x1f0   :  { %v1215_v34 = vadd.f32 %v1214_v56, %v3694_v33  ;;  %v1328_v31 = vadd.f32 %v1327_v55, %v3696_v8  ;;  %v1396_v59 = vmax.f32 %v1213_v15, 0.0  ;;  %v1398_v62 = vmax.f32 %v1326_v22, 0.0 }
 0x1f1   :  { %v1218_v35 = vpop.f32.mrf.mxu0  ;;  %v1331_v37 = vpop.f32.mrf.mxu1 }
 0x1f2   :  { %v1397_v41 = vmax.f32 %v1215_v34, 0.0  ;;  %v1399_v25 = vmax.f32 %v1328_v31, 0.0  ;;  %v1440_v17 = vpack.c.bf16 %v1396_v59, %v1392_v38  ;;  %v1442_v26 = vpack.c.bf16 %v1398_v62, %v1394_v10 }
 0x1f3   :  { %v1220_v0 = vpop.f32.mrf.mxu0  ;;  %v1333_v23 = vpop.f32.mrf.mxu1  ;;  %v1219_v29 = vadd.f32 %v1218_v35, %v3700_v12  ;;  %v1332_v40 = vadd.f32 %v1331_v37, %v3702_v5 }
 0x1f4   :  { %v1441_v50 = vpack.c.bf16 %v1397_v41, %v1393_v39  ;;  %v1443_v57 = vpack.c.bf16 %v1399_v25, %v1395_v36  ;;  %v1221_v42 = vadd.f32 %v1220_v0, %v3694_v33  ;;  %v1334_v61 = vadd.f32 %v1333_v23, %v3696_v8 }
 0x1f5   :  { %v1222_v9 = vpop.f32.mrf.mxu0  ;;  %v1335_v28 = vpop.f32.mrf.mxu1  ;;  %v1400_v14 = vmax.f32 %v1219_v29, 0.0  ;;  %v1402_v46 = vmax.f32 %v1332_v40, 0.0 }
 0x1f6   :  { %v1223_v4 = vadd.f32 %v1222_v9, %v3700_v12  ;;  %v1336_v58 = vadd.f32 %v1335_v28, %v3702_v5  ;;  %1924 = vmatprep.mubr.bf16.mxu0 %v1441_v50  ;;  %2037 = vmatprep.mubr.bf16.mxu1 %v1443_v57  ;;  %v1401_v13 = vmax.f32 %v1221_v42, 0.0  ;;  %v1403_v54 = vmax.f32 %v1334_v61, 0.0 }
 0x1f7   :  { %v1224_v1 = vpop.f32.mrf.mxu0  ;;  %v1337_v27 = vpop.f32.mrf.mxu1  ;;  %1925 = vmatmul.mubr.bf16.gmra.mxu0 %v1440_v17  ;;  %2038 = vmatmul.mubr.bf16.gmra.mxu1 %v1442_v26 }
 0x1f8   :  { %v1225_v2 = vadd.f32 %v1224_v1, %v3694_v33  ;;  %v1338_v16 = vadd.f32 %v1337_v27, %v3696_v8  ;;  %v1404_v48 = vmax.f32 %v1223_v4, 0.0  ;;  %v1406_v47 = vmax.f32 %v1336_v58, 0.0 }
 0x1f9   :  { %v1228_v51 = vpop.f32.mrf.mxu0  ;;  %v1341_v6 = vpop.f32.mrf.mxu1 }
 0x1fa   :  { %v1405_v45 = vmax.f32 %v1225_v2, 0.0  ;;  %v1407_v52 = vmax.f32 %v1338_v16, 0.0  ;;  %v1444_v63 = vpack.c.bf16 %v1404_v48, %v1400_v14  ;;  %v1446_v44 = vpack.c.bf16 %v1406_v47, %v1402_v46  ;;  %v2792_v46 = vld [vmem:[%s3953_s12 + $0x40] sm:$0xff]  }
 0x1fb   :  { %v1230_v18 = vpop.f32.mrf.mxu0  ;;  %v1343_v43 = vpop.f32.mrf.mxu1  ;;  %v1229_v22 = vadd.f32 %v1228_v51, %v3700_v12  ;;  %v1342_v3 = vadd.f32 %v1341_v6, %v3702_v5 }
 0x1fc   :  { %v1445_v19 = vpack.c.bf16 %v1405_v45, %v1401_v13  ;;  %v1447_v20 = vpack.c.bf16 %v1407_v52, %v1403_v54  ;;  %v1231_v21 = vadd.f32 %v1230_v18, %v3694_v33  ;;  %v1344_v60 = vadd.f32 %v1343_v43, %v3696_v8  ;;  %v2793_v18 = vld [vmem:[%s3953_s12] sm:$0xff]  }
 0x1fd   :  { %v1232_v53 = vpop.f32.mrf.mxu0  ;;  %v1345_v7 = vpop.f32.mrf.mxu1  ;;  %v1408_v25 = vmax.f32 %v1229_v22, 0.0  ;;  %v1410_v38 = vmax.f32 %v1342_v3, 0.0  ;;  %v1520_v43 = vld [vmem:[%s3952_s11] sm:$0x3] }
 0x1fe   :  { %v1233_v32 = vadd.f32 %v1232_v53, %v3700_v12  ;;  %v1346_v15 = vadd.f32 %v1345_v7, %v3702_v5  ;;  %1934 = vmatprep.mubr.bf16.mxu0 %v1445_v19  ;;  %2047 = vmatprep.mubr.bf16.mxu1 %v1447_v20  ;;  %v1409_v37 = vmax.f32 %v1231_v21, 0.0  ;;  %v1411_v39 = vmax.f32 %v1344_v60, 0.0 }
 0x1ff   :  { %v1234_v24 = vpop.f32.mrf.mxu0  ;;  %v1347_v56 = vpop.f32.mrf.mxu1  ;;  %1935 = vmatmul.mubr.bf16.gmra.mxu0 %v1444_v63  ;;  %2048 = vmatmul.mubr.bf16.gmra.mxu1 %v1446_v44  ;;  %v3818_v19 = vrot.slane %v1520_v43, %v1056_v49  ;;  %v3822_v20 = vrot.slane %v1520_v43, %v1052_v11 }
 0x200   :  { %v1235_v55 = vadd.f32 %v1234_v24, %v3694_v33  ;;  %v1348_v34 = vadd.f32 %v1347_v56, %v3696_v8  ;;  %v1412_v31 = vmax.f32 %v1233_v32, 0.0  ;;  %v1414_v59 = vmax.f32 %v1346_v15, 0.0 }
 0x201   :  { %v1238_v62 = vpop.f32.mrf.mxu0  ;;  %v1351_v35 = vpop.f32.mrf.mxu1 }
 0x202   :  { %v1413_v36 = vmax.f32 %v1235_v55, 0.0  ;;  %v1415_v41 = vmax.f32 %v1348_v34, 0.0  ;;  %v1448_v57 = vpack.c.bf16 %v1412_v31, %v1408_v25  ;;  %v1450_v17 = vpack.c.bf16 %v1414_v59, %v1410_v38 }
 0x203   :  { %v1240_v10 = vpop.f32.mrf.mxu0  ;;  %v1353_v0 = vpop.f32.mrf.mxu1  ;;  %v1239_v58 = vadd.f32 %v1238_v62, %v3700_v12  ;;  %v1352_v29 = vadd.f32 %v1351_v35, %v3702_v5 }
 0x204   :  { %v1449_v23 = vpack.c.bf16 %v1413_v36, %v1409_v37  ;;  %v1451_v50 = vpack.c.bf16 %v1415_v41, %v1411_v39  ;;  %v1241_v26 = vadd.f32 %v1240_v10, %v3694_v33  ;;  %v1354_v28 = vadd.f32 %v1353_v0, %v3696_v8 }
 0x205   :  { %v1242_v42 = vpop.f32.mrf.mxu0  ;;  %v1355_v9 = vpop.f32.mrf.mxu1  ;;  %v1416_v54 = vmax.f32 %v1239_v58, 0.0  ;;  %v1418_v45 = vmax.f32 %v1352_v29, 0.0 }
 0x206   :  { %v1243_v61 = vadd.f32 %v1242_v42, %v3700_v12  ;;  %v1356_v4 = vadd.f32 %v1355_v9, %v3702_v5  ;;  %1944 = vmatprep.mubr.bf16.mxu0 %v1449_v23  ;;  %2057 = vmatprep.mubr.bf16.mxu1 %v1451_v50  ;;  %v1417_v47 = vmax.f32 %v1241_v26, 0.0  ;;  %v1419_v51 = vmax.f32 %v1354_v28, 0.0 }
 0x207   :  { %v1244_v40 = vpop.f32.mrf.mxu0  ;;  %v1357_v1 = vpop.f32.mrf.mxu1  ;;  %1945 = vmatmul.mubr.bf16.gmra.mxu0 %v1448_v57  ;;  %2058 = vmatmul.mubr.bf16.gmra.mxu1 %v1450_v17 }
 0x208   :  { %v1245_v27 = vadd.f32 %v1244_v40, %v3694_v33  ;;  %v1358_v2 = vadd.f32 %v1357_v1, %v3696_v8  ;;  %v1420_v16 = vmax.f32 %v1243_v61, 0.0  ;;  %v1422_v48 = vmax.f32 %v1356_v4, 0.0  ;;  %v2790_v33 = vld [vmem:[%s3953_s12 + $0x48] sm:$0xff]  }
 0x209   :  { %v2791_v8 = vld [vmem:[%s3953_s12 + $0x8] sm:$0xff]   ;;  %2556 = vmatprep.subr.bf16.mxu0 %v2790_v33 }
 0x20a   :  { %v1421_v6 = vmax.f32 %v1245_v27, 0.0  ;;  %v1423_v13 = vmax.f32 %v1358_v2, 0.0  ;;  %v1452_v14 = vpack.c.bf16 %v1420_v16, %v1416_v54  ;;  %v1454_v5 = vpack.c.bf16 %v1422_v48, %v1418_v45  ;;  %2557 = vmatpush3.bf16.msra.mxu0 %v2791_v8 }
 0x20b   :  { %2558 = vmatprep.subr.bf16.mxu0 %v2792_v46 }
 0x20c   :  { %v1453_v52 = vpack.c.bf16 %v1421_v6, %v1417_v47  ;;  %v1455_v12 = vpack.c.bf16 %v1423_v13, %v1419_v51 }
 0x20e   :  { %1954 = vmatprep.mubr.bf16.mxu0 %v1453_v52  ;;  %2067 = vmatprep.mubr.bf16.mxu1 %v1455_v12 }
 0x20f   :  { %1955 = vmatmul.mubr.bf16.gmra.mxu0 %v1452_v14  ;;  %2068 = vmatmul.mubr.bf16.gmra.mxu1 %v1454_v5 }
 0x210   :  { %2559 = vmatpush3.bf16.msra.mxu0 %v2793_v18 }
 0x297   :  { %v1886_v63 = vpop.f32.mrf.mxu0  ;;  %v1999_v44 = vpop.f32.mrf.mxu1 }
 0x298   :  { %v1887_v60 = vadd.f32 %v1886_v63, %v3822_v20 }
 0x299   :  { %v1888_v21 = vpop.f32.mrf.mxu0  ;;  %v2001_v53 = vpop.f32.mrf.mxu1 }
 0x29a   :  { %v1889_v7 = vadd.f32 %v1888_v21, %v3818_v19  ;;  %v2000_v11 = vadd.f32 %v1999_v44, %v1887_v60 }
 0x29b   :  { %v1890_v32 = vpop.f32.mrf.mxu0  ;;  %v2003_v15 = vpop.f32.mrf.mxu1 }
 0x29c   :  { %v1891_v22 = vadd.f32 %v1890_v32, %v3822_v20  ;;  %v2002_v49 = vadd.f32 %v2001_v53, %v1889_v7  ;;  %v2078_v41 = vmax.f32 %v2000_v11, 0.0 }
 0x29d   :  { %v1892_v3 = vpop.f32.mrf.mxu0  ;;  %v2005_v24 = vpop.f32.mrf.mxu1 }
 0x29e   :  { %v2004_v56 = vadd.f32 %v2003_v15, %v1891_v22  ;;  %v1893_v30 = vadd.f32 %v1892_v3, %v3818_v19  ;;  %v2079_v37 = vmax.f32 %v2002_v49, 0.0 }
 0x29f   :  { %v1896_v55 = vpop.f32.mrf.mxu0  ;;  %v2009_v34 = vpop.f32.mrf.mxu1 }
 0x2a0   :  { %v2006_v31 = vadd.f32 %v2005_v24, %v1893_v30  ;;  %v2080_v59 = vmax.f32 %v2004_v56, 0.0  ;;  %v1897_v25 = vadd.f32 %v1896_v55, %v3822_v20 }
 0x2a1   :  { %v1898_v62 = vpop.f32.mrf.mxu0  ;;  %v2011_v35 = vpop.f32.mrf.mxu1 }
 0x2a2   :  { %v2081_v39 = vmax.f32 %v2006_v31, 0.0  ;;  %v1899_v36 = vadd.f32 %v1898_v62, %v3818_v19  ;;  %v2110_v50 = vpack.c.bf16 %v2080_v59, %v2078_v41  ;;  %v2010_v28 = vadd.f32 %v2009_v34, %v1897_v25 }
 0x2a3   :  { %v1900_v38 = vpop.f32.mrf.mxu0  ;;  %v2013_v10 = vpop.f32.mrf.mxu1 }
 0x2a4   :  { %v2111_v0 = vpack.c.bf16 %v2081_v39, %v2079_v37  ;;  %v1901_v23 = vadd.f32 %v1900_v38, %v3822_v20  ;;  %v2012_v26 = vadd.f32 %v2011_v35, %v1899_v36  ;;  %v2082_v48 = vmax.f32 %v2010_v28, 0.0 }
 0x2a5   :  { %v1902_v57 = vpop.f32.mrf.mxu0  ;;  %v2015_v17 = vpop.f32.mrf.mxu1 }
 0x2a6   :  { %v2014_v42 = vadd.f32 %v2013_v10, %v1901_v23  ;;  %v1903_v9 = vadd.f32 %v1902_v57, %v3818_v19  ;;  %2293 = vmatprep.mubr.bf16.mxu0 %v2111_v0  ;;  %v2083_v27 = vmax.f32 %v2012_v26, 0.0 }
 0x2a7   :  { %v1906_v61 = vpop.f32.mrf.mxu0  ;;  %v2019_v4 = vpop.f32.mrf.mxu1  ;;  %2294 = vmatmul.mubr.bf16.vlgmr.msra.gmra.mxu0 %v2110_v50 }
 0x2a8   :  { %v2016_v58 = vadd.f32 %v2015_v17, %v1903_v9  ;;  %v2084_v29 = vmax.f32 %v2014_v42, 0.0  ;;  %v1907_v47 = vadd.f32 %v1906_v61, %v3822_v20 }
 0x2a9   :  { %v1908_v40 = vpop.f32.mrf.mxu0  ;;  %v2021_v1 = vpop.f32.mrf.mxu1 }
 0x2aa   :  { %v2085_v2 = vmax.f32 %v2016_v58, 0.0  ;;  %v1909_v16 = vadd.f32 %v1908_v40, %v3818_v19  ;;  %v2112_v45 = vpack.c.bf16 %v2084_v29, %v2082_v48  ;;  %v2020_v8 = vadd.f32 %v2019_v4, %v1907_v47 }
 0x2ab   :  { %v1910_v51 = vpop.f32.mrf.mxu0  ;;  %v2023_v6 = vpop.f32.mrf.mxu1 }
 0x2ac   :  { %v2113_v13 = vpack.c.bf16 %v2085_v2, %v2083_v27  ;;  %v1911_v54 = vadd.f32 %v1910_v51, %v3822_v20  ;;  %v2022_v14 = vadd.f32 %v2021_v1, %v1909_v16  ;;  %v2086_v32 = vmax.f32 %v2020_v8, 0.0 }
 0x2ad   :  { %v1912_v52 = vpop.f32.mrf.mxu0  ;;  %v2025_v12 = vpop.f32.mrf.mxu1 }
 0x2ae   :  { %v2024_v5 = vadd.f32 %v2023_v6, %v1911_v54  ;;  %v1913_v33 = vadd.f32 %v1912_v52, %v3818_v19  ;;  %2301 = vmatprep.mubr.bf16.mxu0 %v2113_v13  ;;  %v2087_v53 = vmax.f32 %v2022_v14, 0.0 }
 0x2af   :  { %v1916_v46 = vpop.f32.mrf.mxu0  ;;  %v2029_v18 = vpop.f32.mrf.mxu1  ;;  %2302 = vmatmul.mubr.bf16.gmra.mxu0 %v2112_v45 }
 0x2b0   :  { %v2026_v43 = vadd.f32 %v2025_v12, %v1913_v33  ;;  %v2088_v63 = vmax.f32 %v2024_v5, 0.0  ;;  %v1917_v15 = vadd.f32 %v1916_v46, %v3822_v20 }
 0x2b1   :  { %v1918_v44 = vpop.f32.mrf.mxu0  ;;  %v2031_v21 = vpop.f32.mrf.mxu1 }
 0x2b2   :  { %v2089_v7 = vmax.f32 %v2026_v43, 0.0  ;;  %v1919_v60 = vadd.f32 %v1918_v44, %v3818_v19  ;;  %v2114_v56 = vpack.c.bf16 %v2088_v63, %v2086_v32  ;;  %v2030_v59 = vadd.f32 %v2029_v18, %v1917_v15 }
 0x2b3   :  { %v1920_v22 = vpop.f32.mrf.mxu0  ;;  %v2033_v3 = vpop.f32.mrf.mxu1 }
 0x2b4   :  { %v2115_v24 = vpack.c.bf16 %v2089_v7, %v2087_v53  ;;  %v1921_v49 = vadd.f32 %v1920_v22, %v3822_v20  ;;  %v2032_v55 = vadd.f32 %v2031_v21, %v1919_v60  ;;  %v2090_v0 = vmax.f32 %v2030_v59, 0.0 }
 0x2b5   :  { %v1922_v30 = vpop.f32.mrf.mxu0  ;;  %v2035_v11 = vpop.f32.mrf.mxu1 }
 0x2b6   :  { %v2034_v34 = vadd.f32 %v2033_v3, %v1921_v49  ;;  %v1923_v31 = vadd.f32 %v1922_v30, %v3818_v19  ;;  %2309 = vmatprep.mubr.bf16.mxu0 %v2115_v24  ;;  %v2091_v25 = vmax.f32 %v2032_v55, 0.0 }
 0x2b7   :  { %v1926_v62 = vpop.f32.mrf.mxu0  ;;  %v2039_v35 = vpop.f32.mrf.mxu1  ;;  %2310 = vmatmul.mubr.bf16.gmra.mxu0 %v2114_v56 }
 0x2b8   :  { %v2036_v37 = vadd.f32 %v2035_v11, %v1923_v31  ;;  %v2092_v39 = vmax.f32 %v2034_v34, 0.0  ;;  %v1927_v23 = vadd.f32 %v1926_v62, %v3822_v20 }
 0x2b9   :  { %v1928_v36 = vpop.f32.mrf.mxu0  ;;  %v2041_v41 = vpop.f32.mrf.mxu1 }
 0x2ba   :  { %v2093_v38 = vmax.f32 %v2036_v37, 0.0  ;;  %v1929_v10 = vadd.f32 %v1928_v36, %v3818_v19  ;;  %v2116_v42 = vpack.c.bf16 %v2092_v39, %v2090_v0  ;;  %v2040_v29 = vadd.f32 %v2039_v35, %v1927_v23 }
 0x2bb   :  { %v1930_v50 = vpop.f32.mrf.mxu0  ;;  %v2043_v57 = vpop.f32.mrf.mxu1 }
 0x2bc   :  { %v2117_v17 = vpack.c.bf16 %v2093_v38, %v2091_v25  ;;  %v1931_v26 = vadd.f32 %v1930_v50, %v3822_v20  ;;  %v2042_v61 = vadd.f32 %v2041_v41, %v1929_v10  ;;  %v2094_v13 = vmax.f32 %v2040_v29, 0.0 }
 0x2bd   :  { %v1932_v9 = vpop.f32.mrf.mxu0  ;;  %v2045_v28 = vpop.f32.mrf.mxu1 }
 0x2be   :  { %v2044_v4 = vadd.f32 %v2043_v57, %v1931_v26  ;;  %v1933_v58 = vadd.f32 %v1932_v9, %v3818_v19  ;;  %2317 = vmatprep.mubr.bf16.mxu0 %v2117_v17  ;;  %v2095_v47 = vmax.f32 %v2042_v61, 0.0 }
 0x2bf   :  { %v1936_v40 = vpop.f32.mrf.mxu0  ;;  %v2049_v1 = vpop.f32.mrf.mxu1  ;;  %2318 = vmatmul.mubr.bf16.gmra.mxu0 %v2116_v42 }
 0x2c0   :  { %v2046_v27 = vadd.f32 %v2045_v28, %v1933_v58  ;;  %v2096_v2 = vmax.f32 %v2044_v4, 0.0  ;;  %v1937_v54 = vadd.f32 %v1936_v40, %v3822_v20 }
 0x2c1   :  { %v1938_v16 = vpop.f32.mrf.mxu0  ;;  %v2051_v48 = vpop.f32.mrf.mxu1 }
 0x2c2   :  { %v2097_v51 = vmax.f32 %v2046_v27, 0.0  ;;  %v1939_v6 = vadd.f32 %v1938_v16, %v3818_v19  ;;  %v2118_v5 = vpack.c.bf16 %v2096_v2, %v2094_v13  ;;  %v2050_v63 = vadd.f32 %v2049_v1, %v1937_v54 }
 0x2c3   :  { %v1940_v45 = vpop.f32.mrf.mxu0  ;;  %v2053_v52 = vpop.f32.mrf.mxu1 }
 0x2c4   :  { %v2119_v12 = vpack.c.bf16 %v2097_v51, %v2095_v47  ;;  %v1941_v14 = vadd.f32 %v1940_v45, %v3822_v20  ;;  %v2052_v46 = vadd.f32 %v2051_v48, %v1939_v6  ;;  %v2098_v24 = vmax.f32 %v2050_v63, 0.0  ;;  %v3859_v45 = vld [vmem:[%s3954_s13] ss:$0 sm:$0xff] }
 0x2c5   :  { %v1942_v33 = vpop.f32.mrf.mxu0  ;;  %v2055_v8 = vpop.f32.mrf.mxu1 }
 0x2c6   :  { %v2054_v18 = vadd.f32 %v2053_v52, %v1941_v14  ;;  %v1943_v43 = vadd.f32 %v1942_v33, %v3818_v19  ;;  %2325 = vmatprep.mubr.bf16.mxu0 %v2119_v12  ;;  %v2099_v15 = vmax.f32 %v2052_v46, 0.0 }
 0x2c7   :  { %v1946_v44 = vpop.f32.mrf.mxu0  ;;  %v2059_v21 = vpop.f32.mrf.mxu1  ;;  %2326 = vmatmul.mubr.bf16.gmra.mxu0 %v2118_v5 }
 0x2c8   :  { %v2056_v53 = vadd.f32 %v2055_v8, %v1943_v43  ;;  %v2100_v7 = vmax.f32 %v2054_v18, 0.0  ;;  %v1947_v49 = vadd.f32 %v1946_v44, %v3822_v20 }
 0x2c9   :  { %v1948_v60 = vpop.f32.mrf.mxu0  ;;  %v2061_v32 = vpop.f32.mrf.mxu1 }
 0x2ca   :  { %v2101_v22 = vmax.f32 %v2056_v53, 0.0  ;;  %v1949_v3 = vadd.f32 %v1948_v60, %v3818_v19  ;;  %v2120_v34 = vpack.c.bf16 %v2100_v7, %v2098_v24  ;;  %v2060_v39 = vadd.f32 %v2059_v21, %v1947_v49 }
 0x2cb   :  { %v1950_v56 = vpop.f32.mrf.mxu0  ;;  %v2063_v30 = vpop.f32.mrf.mxu1 }
 0x2cc   :  { %v2121_v11 = vpack.c.bf16 %v2101_v22, %v2099_v15  ;;  %v1951_v55 = vadd.f32 %v1950_v56, %v3822_v20  ;;  %v2062_v62 = vadd.f32 %v2061_v32, %v1949_v3  ;;  %v2102_v17 = vmax.f32 %v2060_v39, 0.0 }
 0x2cd   :  { %v1952_v31 = vpop.f32.mrf.mxu0  ;;  %v2065_v59 = vpop.f32.mrf.mxu1 }
 0x2ce   :  { %v2064_v35 = vadd.f32 %v2063_v30, %v1951_v55  ;;  %v1953_v37 = vadd.f32 %v1952_v31, %v3818_v19  ;;  %2333 = vmatprep.mubr.bf16.mxu0 %v2121_v11  ;;  %v2103_v23 = vmax.f32 %v2062_v62, 0.0 }
 0x2cf   :  { %v1956_v36 = vpop.f32.mrf.mxu0  ;;  %v2069_v41 = vpop.f32.mrf.mxu1  ;;  %2334 = vmatmul.mubr.bf16.gmra.mxu0 %v2120_v34 }
 0x2d0   :  { %v2066_v25 = vadd.f32 %v2065_v59, %v1953_v37  ;;  %v2104_v38 = vmax.f32 %v2064_v35, 0.0  ;;  %v1957_v26 = vadd.f32 %v1956_v36, %v3822_v20 }
 0x2d1   :  { %v1958_v10 = vpop.f32.mrf.mxu0  ;;  %v2071_v0 = vpop.f32.mrf.mxu1 }
 0x2d2   :  { %v2105_v50 = vmax.f32 %v2066_v25, 0.0  ;;  %v1959_v57 = vadd.f32 %v1958_v10, %v3818_v19  ;;  %v2122_v4 = vpack.c.bf16 %v2104_v38, %v2102_v17  ;;  %v2070_v27 = vadd.f32 %v2069_v41, %v1957_v26 }
 0x2d3   :  { %v1960_v42 = vpop.f32.mrf.mxu0  ;;  %v2073_v9 = vpop.f32.mrf.mxu1 }
 0x2d4   :  { %v2123_v28 = vpack.c.bf16 %v2105_v50, %v2103_v23  ;;  %v1961_v61 = vadd.f32 %v1960_v42, %v3822_v20  ;;  %v2072_v29 = vadd.f32 %v2071_v0, %v1959_v57  ;;  %v2106_v6 = vmax.f32 %v2070_v27, 0.0 }
 0x2d5   :  { %v1962_v58 = vpop.f32.mrf.mxu0  ;;  %v2075_v2 = vpop.f32.mrf.mxu1 }
 0x2d6   :  { %v2074_v40 = vadd.f32 %v2073_v9, %v1961_v61  ;;  %v1963_v1 = vadd.f32 %v1962_v58, %v3818_v19  ;;  %2341 = vmatprep.mubr.bf16.mxu0 %v2123_v28  ;;  %v2107_v47 = vmax.f32 %v2072_v29, 0.0 }
 0x2d7   :  { %2342 = vmatmul.mubr.bf16.gmra.mxu0 %v2122_v4 }
 0x2d8   :  { %v2076_v16 = vadd.f32 %v2075_v2, %v1963_v1  ;;  %v2108_v48 = vmax.f32 %v2074_v40, 0.0 }
 0x2da   :  { %v2109_v51 = vmax.f32 %v2076_v16, 0.0  ;;  %v2124_v54 = vpack.c.bf16 %v2108_v48, %v2106_v6 }
 0x2dc   :  { %v2125_v13 = vpack.c.bf16 %v2109_v51, %v2107_v47 }
 0x2de   :  { %2349 = vmatprep.mubr.bf16.mxu0 %v2125_v13 }
 0x2df   :  { %2350 = vmatmul.mubr.bf16.gmra.mxu0 %v2124_v54 }
 0x367   :  { %v2560_v20 = vpop.f32.mrf.mxu0 }
 0x369   :  { %v2561_v19 = vpop.f32.mrf.mxu0 }
 0x36a   :  { %v2562_v52 = vadd.f32 %v2561_v19, %v2560_v20 }
 0x36b   :  { %v2563_v12 = vpop.f32.mrf.mxu0 }
 0x36c   :  { %v2296_v14 = vadd.f32 %v2562_v52, %v3859_v45 }
 0x36d   :  { %v2564_v5 = vpop.f32.mrf.mxu0 }
 0x36e   :  { %2359 = vst.msk [vmem:[%s3955_s14] sm:$0xff] %vm2358_vm4, %v2296_v14  ;;  %v2565_v33 = vadd.f32 %v2564_v5, %v2563_v12 }
 0x36f   :  { %v2566_v8 = vpop.f32.mrf.mxu0 }
 0x370   :  { %v2299_v46 = vadd.f32 %v2565_v33, %v3859_v45 }
 0x371   :  { %v2567_v18 = vpop.f32.mrf.mxu0 }
 0x372   :  { %2360 = vst.msk [vmem:[%s3955_s14 + $0x8] sm:$0xff] %vm2358_vm4, %v2299_v46  ;;  %v2568_v43 = vadd.f32 %v2567_v18, %v2566_v8 }
 0x373   :  { %v2569_v63 = vpop.f32.mrf.mxu0 }
 0x374   :  { %v2304_v44 = vadd.f32 %v2568_v43, %v3859_v45 }
 0x375   :  { %v2570_v21 = vpop.f32.mrf.mxu0 }
 0x376   :  { %2361 = vst.msk [vmem:[%s3955_s14 + $0x10] sm:$0xff] %vm2358_vm4, %v2304_v44  ;;  %v2571_v53 = vadd.f32 %v2570_v21, %v2569_v63 }
 0x377   :  { %v2572_v7 = vpop.f32.mrf.mxu0 }
 0x378   :  { %v2307_v60 = vadd.f32 %v2571_v53, %v3859_v45 }
 0x379   :  { %v2573_v32 = vpop.f32.mrf.mxu0 }
 0x37a   :  { %2362 = vst.msk [vmem:[%s3955_s14 + $0x18] sm:$0xff] %vm2358_vm4, %v2307_v60  ;;  %v2574_v15 = vadd.f32 %v2573_v32, %v2572_v7 }
 0x37b   :  { %v2575_v22 = vpop.f32.mrf.mxu0 }
 0x37c   :  { %v2312_v3 = vadd.f32 %v2574_v15, %v3859_v45 }
 0x37d   :  { %v2576_v24 = vpop.f32.mrf.mxu0 }
 0x37e   :  { %2363 = vst.msk [vmem:[%s3955_s14 + $0x20] sm:$0xff] %vm2358_vm4, %v2312_v3  ;;  %v2577_v49 = vadd.f32 %v2576_v24, %v2575_v22 }
 0x37f   :  { %v2578_v56 = vpop.f32.mrf.mxu0 }
 0x380   :  { %v2315_v30 = vadd.f32 %v2577_v49, %v3859_v45 }
 0x381   :  { %v2579_v11 = vpop.f32.mrf.mxu0 }
 0x382   :  { %2364 = vst.msk [vmem:[%s3955_s14 + $0x28] sm:$0xff] %vm2358_vm4, %v2315_v30  ;;  %v2580_v55 = vadd.f32 %v2579_v11, %v2578_v56 }
 0x383   :  { %v2581_v34 = vpop.f32.mrf.mxu0 }
 0x384   :  { %v2320_v31 = vadd.f32 %v2580_v55, %v3859_v45 }
 0x385   :  { %v2582_v59 = vpop.f32.mrf.mxu0 }
 0x386   :  { %2365 = vst.msk [vmem:[%s3955_s14 + $0x30] sm:$0xff] %vm2358_vm4, %v2320_v31  ;;  %v2583_v62 = vadd.f32 %v2582_v59, %v2581_v34 }
 0x387   :  { %v2584_v35 = vpop.f32.mrf.mxu0 }
 0x388   :  { %v2323_v37 = vadd.f32 %v2583_v62, %v3859_v45 }
 0x389   :  { %v2585_v39 = vpop.f32.mrf.mxu0 }
 0x38a   :  { %2366 = vst.msk [vmem:[%s3955_s14 + $0x38] sm:$0xff] %vm2358_vm4, %v2323_v37  ;;  %v2586_v36 = vadd.f32 %v2585_v39, %v2584_v35 }
 0x38b   :  { %v2587_v41 = vpop.f32.mrf.mxu0 }
 0x38c   :  { %v2328_v25 = vadd.f32 %v2586_v36, %v3859_v45 }
 0x38d   :  { %v2588_v38 = vpop.f32.mrf.mxu0 }
 0x38e   :  { %2367 = vst.msk [vmem:[%s3955_s14 + $0x40] sm:$0xff] %vm2358_vm4, %v2328_v25  ;;  %v2589_v10 = vadd.f32 %v2588_v38, %v2587_v41 }
 0x38f   :  { %v2590_v0 = vpop.f32.mrf.mxu0 }
 0x390   :  { %v2331_v23 = vadd.f32 %v2589_v10, %v3859_v45 }
 0x391   :  { %v2591_v50 = vpop.f32.mrf.mxu0 }
 0x392   :  { %2368 = vst.msk [vmem:[%s3955_s14 + $0x48] sm:$0xff] %vm2358_vm4, %v2331_v23  ;;  %v2592_v57 = vadd.f32 %v2591_v50, %v2590_v0 }
 0x393   :  { %v2593_v17 = vpop.f32.mrf.mxu0 }
 0x394   :  { %v2336_v26 = vadd.f32 %v2592_v57, %v3859_v45 }
 0x395   :  { %v2594_v42 = vpop.f32.mrf.mxu0 }
 0x396   :  { %2369 = vst.msk [vmem:[%s3955_s14 + $0x50] sm:$0xff] %vm2358_vm4, %v2336_v26  ;;  %v2595_v9 = vadd.f32 %v2594_v42, %v2593_v17 }
 0x397   :  { %v2596_v28 = vpop.f32.mrf.mxu0 }
 0x398   :  { %v2339_v61 = vadd.f32 %v2595_v9, %v3859_v45 }
 0x399   :  { %v2597_v4 = vpop.f32.mrf.mxu0 }
 0x39a   :  { %2370 = vst.msk [vmem:[%s3955_s14 + $0x58] sm:$0xff] %vm2358_vm4, %v2339_v61  ;;  %v2598_v58 = vadd.f32 %v2597_v4, %v2596_v28 }
 0x39b   :  { %v2599_v29 = vpop.f32.mrf.mxu0 }
 0x39c   :  { %v2344_v40 = vadd.f32 %v2598_v58, %v3859_v45 }
 0x39d   :  { %v2600_v1 = vpop.f32.mrf.mxu0 }
 0x39e   :  { %2371 = vst.msk [vmem:[%s3955_s14 + $0x60] sm:$0xff] %vm2358_vm4, %v2344_v40  ;;  %v2601_v27 = vadd.f32 %v2600_v1, %v2599_v29 }
 0x39f   :  { %v2602_v2 = vpop.f32.mrf.mxu0 }
 0x3a0   :  { %v2347_v16 = vadd.f32 %v2601_v27, %v3859_v45 }
 0x3a1   :  { %v2603_v48 = vpop.f32.mrf.mxu0 }
 0x3a2   :  { %2372 = vst.msk [vmem:[%s3955_s14 + $0x68] sm:$0xff] %vm2358_vm4, %v2347_v16  ;;  %v2604_v47 = vadd.f32 %v2603_v48, %v2602_v2 }
 0x3a3   :  { %v2605_v51 = vpop.f32.mrf.mxu0 }
 0x3a4   :  { %v2352_v6 = vadd.f32 %v2604_v47, %v3859_v45 }
 0x3a5   :  { %v2606_v13 = vpop.f32.mrf.mxu0 }
 0x3a6   :  { %2373 = vst.msk [vmem:[%s3955_s14 + $0x70] sm:$0xff] %vm2358_vm4, %v2352_v6  ;;  %v2607_v54 = vadd.f32 %v2606_v13, %v2605_v51 }
 0x3a8   :  { %v2355_v20 = vadd.f32 %v2607_v54, %v3859_v45 }
 0x3aa   :  { %2374 = vst.msk [vmem:[%s3955_s14 + $0x78] sm:$0xff] %vm2358_vm4, %v2355_v20 }
 0x3ab   :  { %2379 = vsyncpa [#allocation4], 1 }

</bundles_post_ra>
